<compile_context>
chip_gen: v5e
topology: v5e:2x2
jax: 0.10.0
libtpu: 0.0.40
codegen_flags: <defaults>
</compile_context>

<pallas_src>
import jax
import jax.numpy as jnp
from jax.experimental import pallas as pl
from jax.experimental.pallas import tpu as pltpu

IN_FEATURES = 28 * 28      # 784  (multiple of 8 -> legal sublane dim, no K pad needed)
HIDDEN = 512
OUT_FEATURES = 10
OUT_PAD = 128              # lane-dense output width (unmasked full-width stores)
BATCH_TILE_MAX = 256       # keeps grid >= 2 for B > 256 (both v7x TCs busy)


def _round_up(x, m):
    return (x + m - 1) // m * m


def mlp_kernel(x_ref, w1_ref, b1_ref, w2_ref, b2_ref, w3_ref, b3_ref, out_ref):
    # Three MXU matmuls with bf16 operands + f32 accumulation, bias/ReLU fused.
    x = x_ref[...].astype(jnp.bfloat16)                                      # (bt, 784)
    h1 = jnp.dot(x, w1_ref[...], preferred_element_type=jnp.float32)         # (bt, 512)
    h1 = jnp.maximum(h1 + b1_ref[...], 0.0)
    h2 = jnp.dot(h1.astype(jnp.bfloat16), w2_ref[...],
                 preferred_element_type=jnp.float32)                         # (bt, 512)
    h2 = jnp.maximum(h2 + b2_ref[...], 0.0)
    logits = jnp.dot(h2.astype(jnp.bfloat16), w3_ref[...],
                     preferred_element_type=jnp.float32)                     # (bt, 128)
    out_ref[...] = (logits + b3_ref[...]).astype(out_ref.dtype)


def prepare_params(params):
    """One-time prep (outside the hot path): transpose PyTorch (out,in) weights
    to (in,out), cast to bf16, and zero-pad only the 10-wide output dim."""
    w1 = params["w1"].T.astype(jnp.bfloat16)                                 # (784, 512)
    w2 = params["w2"].T.astype(jnp.bfloat16)                                 # (512, 512)
    w3 = jnp.zeros((HIDDEN, OUT_PAD), jnp.bfloat16).at[:, :OUT_FEATURES].set(
        params["w3"].T.astype(jnp.bfloat16))                                 # (512, 128)
    b1 = params["b1"].reshape(1, HIDDEN).astype(jnp.float32)
    b2 = params["b2"].reshape(1, HIDDEN).astype(jnp.float32)
    b3 = jnp.zeros((1, OUT_PAD), jnp.float32).at[:, :OUT_FEATURES].set(
        params["b3"].reshape(1, OUT_FEATURES).astype(jnp.float32))
    return {"w1": w1, "b1": b1, "w2": w2, "b2": b2, "w3": w3, "b3": b3}


def neural_network_forward(x_nchw, prepared, unpad=True):
    """x_nchw: (B, 1, 28, 28) float32; prepared: output of prepare_params().

    If unpad=False, returns the lane-dense (B_pad, 128) slab directly (columns
    >= 10 are bias-only garbage); useful for consumers like argmax over [:, :10]
    that tolerate padding and want to skip the extra HBM slice pass.
    """
    B = x_nchw.shape[0]
    # torch.nn.Flatten: flatten everything but batch (row-major). No K padding.
    x = x_nchw.reshape(B, -1).astype(jnp.float32)              # (B, 784)

    # Batch tile: multiple of 16 (bf16 sublane packing); full batch per step
    # when small, 256 otherwise (grid >= 2 so v7x can use both TensorCores).
    bt = min(BATCH_TILE_MAX, _round_up(B, 16))
    B_pad = _round_up(B, bt)
    if B_pad != B:
        x = jnp.pad(x, ((0, B_pad - B), (0, 0)))
    grid = (B_pad // bt,)

    out = pl.pallas_call(
        mlp_kernel,
        out_shape=jax.ShapeDtypeStruct((B_pad, OUT_PAD), jnp.float32),
        grid_spec=pltpu.PrefetchScalarGridSpec(
            num_scalar_prefetch=0,
            grid=grid,
            in_specs=[
                # batch-tiled activations: last dim 784 equals full array dim
                pl.BlockSpec((bt, IN_FEATURES), lambda i: (i, 0)),
                # weights/biases: constant index_map -> stay resident in VMEM
                pl.BlockSpec((IN_FEATURES, HIDDEN), lambda i: (0, 0)),
                pl.BlockSpec((1, HIDDEN), lambda i: (0, 0)),
                pl.BlockSpec((HIDDEN, HIDDEN), lambda i: (0, 0)),
                pl.BlockSpec((1, HIDDEN), lambda i: (0, 0)),
                pl.BlockSpec((HIDDEN, OUT_PAD), lambda i: (0, 0)),
                pl.BlockSpec((1, OUT_PAD), lambda i: (0, 0)),
            ],
            out_specs=pl.BlockSpec((bt, OUT_PAD), lambda i: (i, 0)),
        ),
        compiler_params=pltpu.CompilerParams(
            dimension_semantics=("parallel",),
            vmem_limit_bytes=32 * 1024 * 1024,
        ),
    )(x, prepared["w1"], prepared["b1"], prepared["w2"], prepared["b2"],
      prepared["w3"], prepared["b3"])

    if not unpad:
        return out
    # Strip batch + lane padding to match nn.Module output shape (B, 10).
    return out[:B, :OUT_FEATURES]


def init_params(key):
    """Deterministic synthetic parameters with PyTorch nn.Linear layouts."""
    k1, k2, k3, k4, k5, k6 = jax.random.split(key, 6)
    scale = 0.02
    return {
        "w1": scale * jax.random.normal(k1, (HIDDEN, IN_FEATURES), jnp.float32),
        "b1": scale * jax.random.normal(k2, (HIDDEN,), jnp.float32),
        "w2": scale * jax.random.normal(k3, (HIDDEN, HIDDEN), jnp.float32),
        "b2": scale * jax.random.normal(k4, (HIDDEN,), jnp.float32),
        "w3": scale * jax.random.normal(k5, (OUT_FEATURES, HIDDEN), jnp.float32),
        "b3": scale * jax.random.normal(k6, (OUT_FEATURES,), jnp.float32),
    }


def reference_forward(x_nchw, params):
    x = x_nchw.reshape(x_nchw.shape[0], -1)
    h1 = jnp.maximum(x @ params["w1"].T + params["b1"], 0.0)
    h2 = jnp.maximum(h1 @ params["w2"].T + params["b2"], 0.0)
    return h2 @ params["w3"].T + params["b3"]


if __name__ == "__main__":
    key = jax.random.PRNGKey(0)
    k_param, k_x1, k_x2 = jax.random.split(key, 3)
    params = init_params(k_param)
    prepared = prepare_params(params)   # one-time weight transpose/cast/pad

    # bf16 MXU operands -> loosened tolerance vs the f32 reference.
    ATOL, RTOL = 2e-2, 2e-2

    # Small-batch check (single grid step, full batch per step).
    B = 8
    x = jax.random.normal(k_x1, (B, 1, 28, 28), jnp.float32)  # NCHW, MNIST-like
    logits = jax.block_until_ready(neural_network_forward(x, prepared))
    ref = reference_forward(x, params)
    assert logits.shape == (B, OUT_FEATURES)
    assert jnp.allclose(logits, ref, atol=ATOL, rtol=RTOL), "mismatch vs reference (B=8)"

    # Larger-batch check exercising the 256-row tile and multi-step grid.
    B2 = 512
    x2 = jax.random.normal(k_x2, (B2, 1, 28, 28), jnp.float32)
    logits2 = jax.block_until_ready(neural_network_forward(x2, prepared))
    ref2 = reference_forward(x2, params)
    assert logits2.shape == (B2, OUT_FEATURES)
    assert jnp.allclose(logits2, ref2, atol=ATOL, rtol=RTOL), "mismatch vs reference (B=512)"

    print("KERNEL_OK")
</pallas_src>

<mosaic_0001>
module attributes {stable_mosaic.version = 11 : i64} {
  func.func @mlp_kernel(%arg0: i32, %arg1: memref<16x784xf32, #tpu.memory_space<vmem>>, %arg2: memref<784x512xbf16, #tpu.memory_space<vmem>>, %arg3: memref<1x512xf32, #tpu.memory_space<vmem>>, %arg4: memref<512x512xbf16, #tpu.memory_space<vmem>>, %arg5: memref<1x512xf32, #tpu.memory_space<vmem>>, %arg6: memref<512x128xbf16, #tpu.memory_space<vmem>>, %arg7: memref<1x128xf32, #tpu.memory_space<vmem>>, %arg8: memref<16x128xf32, #tpu.memory_space<vmem>>) attributes {dimension_semantics = [#tpu.dimension_semantics<parallel>], iteration_bounds = array<i64: 1>, scalar_prefetch = 0 : i64, scratch_operands = 0 : i64, tpu.core_type = #tpu.core_type<tc>, window_params = [{transform_indices = @transform_0, window_bounds = array<i64: 16, 784>}, {pipeline_mode = #tpu.pipeline_mode<synchronous>, transform_indices = @transform_1, window_bounds = array<i64: 784, 512>}, {pipeline_mode = #tpu.pipeline_mode<synchronous>, transform_indices = @transform_2, window_bounds = array<i64: 1, 512>}, {pipeline_mode = #tpu.pipeline_mode<synchronous>, transform_indices = @transform_3, window_bounds = array<i64: 512, 512>}, {pipeline_mode = #tpu.pipeline_mode<synchronous>, transform_indices = @transform_4, window_bounds = array<i64: 1, 512>}, {pipeline_mode = #tpu.pipeline_mode<synchronous>, transform_indices = @transform_5, window_bounds = array<i64: 512, 128>}, {pipeline_mode = #tpu.pipeline_mode<synchronous>, transform_indices = @transform_6, window_bounds = array<i64: 1, 128>}, {transform_indices = @transform_7, window_bounds = array<i64: 16, 128>}]} {
    %c0 = arith.constant 0 : index
    %c0_0 = arith.constant 0 : index
    %0 = vector.load %arg1[%c0, %c0_0] : memref<16x784xf32, #tpu.memory_space<vmem>>, vector<16x784xf32>
    %1 = arith.truncf %0 : vector<16x784xf32> to vector<16x784xbf16>
    %c0_1 = arith.constant 0 : index
    %c0_2 = arith.constant 0 : index
    %2 = vector.load %arg2[%c0_1, %c0_2] : memref<784x512xbf16, #tpu.memory_space<vmem>>, vector<784x512xbf16>
    %cst = arith.constant dense<0.000000e+00> : vector<16x512xf32>
    %3 = tpu.matmul %1, %2, %cst {dimension_numbers = #tpu.dot_dimension_numbers<[1], [0], [0], [1], [0, 0, 1, 1], [], []>} : vector<16x784xbf16>, vector<784x512xbf16>, vector<16x512xf32> -> vector<16x512xf32>
    %c0_3 = arith.constant 0 : index
    %c0_4 = arith.constant 0 : index
    %4 = vector.load %arg3[%c0_3, %c0_4] : memref<1x512xf32, #tpu.memory_space<vmem>>, vector<1x512xf32>
    %5 = vector.broadcast %4 : vector<1x512xf32> to vector<16x512xf32>
    %6 = arith.addf %3, %5 : vector<16x512xf32>
    %cst_5 = arith.constant 0.000000e+00 : f32
    %7 = vector.broadcast %cst_5 : f32 to vector<16x512xf32>
    %8 = arith.maximumf %6, %7 : vector<16x512xf32>
    %9 = arith.truncf %8 : vector<16x512xf32> to vector<16x512xbf16>
    %c0_6 = arith.constant 0 : index
    %c0_7 = arith.constant 0 : index
    %10 = vector.load %arg4[%c0_6, %c0_7] : memref<512x512xbf16, #tpu.memory_space<vmem>>, vector<512x512xbf16>
    %cst_8 = arith.constant dense<0.000000e+00> : vector<16x512xf32>
    %11 = tpu.matmul %9, %10, %cst_8 {dimension_numbers = #tpu.dot_dimension_numbers<[1], [0], [0], [1], [0, 0, 1, 1], [], []>} : vector<16x512xbf16>, vector<512x512xbf16>, vector<16x512xf32> -> vector<16x512xf32>
    %c0_9 = arith.constant 0 : index
    %c0_10 = arith.constant 0 : index
    %12 = vector.load %arg5[%c0_9, %c0_10] : memref<1x512xf32, #tpu.memory_space<vmem>>, vector<1x512xf32>
    %13 = vector.broadcast %12 : vector<1x512xf32> to vector<16x512xf32>
    %14 = arith.addf %11, %13 : vector<16x512xf32>
    %cst_11 = arith.constant 0.000000e+00 : f32
    %15 = vector.broadcast %cst_11 : f32 to vector<16x512xf32>
    %16 = arith.maximumf %14, %15 : vector<16x512xf32>
    %17 = arith.truncf %16 : vector<16x512xf32> to vector<16x512xbf16>
    %c0_12 = arith.constant 0 : index
    %c0_13 = arith.constant 0 : index
    %18 = vector.load %arg6[%c0_12, %c0_13] : memref<512x128xbf16, #tpu.memory_space<vmem>>, vector<512x128xbf16>
    %cst_14 = arith.constant dense<0.000000e+00> : vector<16x128xf32>
    %19 = tpu.matmul %17, %18, %cst_14 {dimension_numbers = #tpu.dot_dimension_numbers<[1], [0], [0], [1], [0, 0, 1, 1], [], []>} : vector<16x512xbf16>, vector<512x128xbf16>, vector<16x128xf32> -> vector<16x128xf32>
    %c0_15 = arith.constant 0 : index
    %c0_16 = arith.constant 0 : index
    %20 = vector.load %arg7[%c0_15, %c0_16] : memref<1x128xf32, #tpu.memory_space<vmem>>, vector<1x128xf32>
    %21 = vector.broadcast %20 : vector<1x128xf32> to vector<16x128xf32>
    %22 = arith.addf %19, %21 : vector<16x128xf32>
    %c0_17 = arith.constant 0 : index
    %c0_18 = arith.constant 0 : index
    %23 = vector.load %arg8[%c0_17, %c0_18] : memref<16x128xf32, #tpu.memory_space<vmem>>, vector<16x128xf32>
    tpu.vector_store %arg8[%c0_17, %c0_18], %22 {strides = array<i32>} : memref<16x128xf32, #tpu.memory_space<vmem>>, vector<16x128xf32>,
    return
  }
  func.func @transform_0(%arg0: i32) -> (i32, i32) {
    %c0_i32 = arith.constant 0 : i32
    %c0_i32_0 = arith.constant 0 : i32
    return %arg0, %c0_i32 : i32, i32
  }
  func.func @transform_1(%arg0: i32) -> (i32, i32) {
    %c0_i32 = arith.constant 0 : i32
    %c0_i32_0 = arith.constant 0 : i32
    %c0_i32_1 = arith.constant 0 : i32
    return %c0_i32, %c0_i32_0 : i32, i32
  }
  func.func @transform_2(%arg0: i32) -> (i32, i32) {
    %c0_i32 = arith.constant 0 : i32
    %c0_i32_0 = arith.constant 0 : i32
    %c0_i32_1 = arith.constant 0 : i32
    return %c0_i32, %c0_i32_0 : i32, i32
  }
  func.func @transform_3(%arg0: i32) -> (i32, i32) {
    %c0_i32 = arith.constant 0 : i32
    %c0_i32_0 = arith.constant 0 : i32
    %c0_i32_1 = arith.constant 0 : i32
    return %c0_i32, %c0_i32_0 : i32, i32
  }
  func.func @transform_4(%arg0: i32) -> (i32, i32) {
    %c0_i32 = arith.constant 0 : i32
    %c0_i32_0 = arith.constant 0 : i32
    %c0_i32_1 = arith.constant 0 : i32
    return %c0_i32, %c0_i32_0 : i32, i32
  }
  func.func @transform_5(%arg0: i32) -> (i32, i32) {
    %c0_i32 = arith.constant 0 : i32
    %c0_i32_0 = arith.constant 0 : i32
    %c0_i32_1 = arith.constant 0 : i32
    return %c0_i32, %c0_i32_0 : i32, i32
  }
  func.func @transform_6(%arg0: i32) -> (i32, i32) {
    %c0_i32 = arith.constant 0 : i32
    %c0_i32_0 = arith.constant 0 : i32
    %c0_i32_1 = arith.constant 0 : i32
    return %c0_i32, %c0_i32_0 : i32, i32
  }
  func.func @transform_7(%arg0: i32) -> (i32, i32) {
    %c0_i32 = arith.constant 0 : i32
    %c0_i32_0 = arith.constant 0 : i32
    return %arg0, %c0_i32 : i32, i32
  }
}

</mosaic_0001>

<bundles_post_ra>
// kernel: tpu_custom_call.1
= control target key start
LH: loop header
LB: loop body
LE: loop exit
PB: predicated region body
PF: predicated region fallthrough
CT: control target
= control target key end

     0   :  { %12 = vsyncpa [#allocation3], 0  ;;  %s5247_s0 = inlined_call_operand.hbm [shape: f32[16,784], index: 0, kind: input, shape index: {}]   ;;  %s5248_s1 = inlined_call_operand.hbm [shape: bf16[784,512], index: 1, kind: input, shape index: {}]   ;;  %s5249_s2 = inlined_call_operand.hbm [shape: f32[1,512], index: 2, kind: input, shape index: {}]   ;;  %s5250_s3 = inlined_call_operand.hbm [shape: bf16[512,512], index: 3, kind: input, shape index: {}]   ;;  %s5251_s4 = inlined_call_operand.hbm [shape: f32[1,512], index: 4, kind: input, shape index: {}]   ;;  %s5252_s5 = inlined_call_operand.hbm [shape: bf16[512,128], index: 5, kind: input, shape index: {}]   ;;  %s5253_s6 = inlined_call_operand.vmem [shape: f32[1,128], index: 6, kind: input, shape index: {}]   ;;  %s5254_s7 = inlined_call_operand.hbm [shape: f32[16,128], index: 7, kind: output, shape index: {}]  }
   0x1   :  { %13 = vsyncpa [#allocation6], 0 }
   0x2   :  { %14 = vsyncpa [#allocation9], 0 }
   0x3   :  { %15 = vsyncpa [#allocation12], 0  ;;  %s34_s26 = sshll.u32 %s5248_s1, 4  ;;  %s35_s26 = int_to_ptr.hbm [resolvable:$true] %s34_s26 }
   0x4   :  { %16 = vsyncpa [#allocation4], 0  ;;  %s5065_s27 = smov [#allocation5]   ;;  %s58_s8 = sshll.u32 %s5250_s3, 4  ;;  %s59_s8 = int_to_ptr.hbm [resolvable:$true] %s58_s8 }
   0x5   :  { %s36_s28 = sshll.u32 %s5065_s27, 4  ;;  %s5066_s9 = smov 256   ;;  %s37_s28 = int_to_ptr.vmem [resolvable:$true] %s36_s28 }
   0x6   :  { %s5067_s10 = smov 16   ;;  %s5068_s11 = smov [#allocation8]  }
   0x7   :  { %42 = dma.hbm_to_vmem [thread:$0]  %s35_s26, 25088, %s37_s28, [#allocation6], %s5066_s9, %s5066_s9, %s5067_s10  }
   0x8   :  { %s60_s12 = sshll.u32 %s5068_s11, 4  ;;  %s21_s15 = sshll.u32 %s5247_s0, 4  ;;  %s61_s12 = int_to_ptr.vmem [resolvable:$true] %s60_s12  ;;  %s22_s15 = int_to_ptr.hbm [resolvable:$true] %s21_s15 }
   0x9   :  { %66 = dma.hbm_to_vmem [thread:$0]  %s59_s8, 16384, %s61_s12, [#allocation9], %s5066_s9, %s5066_s9, %s5067_s10  }
   0xa   :  { %s5069_s1 = smov [#allocation2]   ;;  %s48_s3 = sshll.u32 %s5249_s2, 4  ;;  %s49_s3 = int_to_ptr.hbm [resolvable:$true] %s48_s3 }
   0xb   :  { %s23_s16 = sshll.u32 %s5069_s1, 4  ;;  %s5070_s19 = smov 896   ;;  %s24_s16 = int_to_ptr.vmem [resolvable:$true] %s23_s16 }
   0xc   :  { %s5071_s20 = smov 56   ;;  %s5072_s21 = smov [#allocation7]  }
   0xd   :  { %29 = dma.hbm_to_vmem [thread:$0]  %s22_s15, 1792, %s24_s16, [#allocation3], %s5070_s19, %s5070_s19, %s5071_s20  }
   0xe   :  { %s50_s22 = sshll.u32 %s5072_s21, 4  ;;  %s72_s0 = sshll.u32 %s5251_s4, 4  ;;  %s51_s22 = int_to_ptr.vmem [resolvable:$true] %s50_s22  ;;  %s73_s0 = int_to_ptr.hbm [resolvable:$true] %s72_s0 }
   0xf   :  { %53 = dma.hbm_to_vmem [thread:$0]  %s49_s3, 64, %s51_s22, [#allocation6]  }
  0x10   :  { %s82_s27 = sshll.u32 %s5252_s5, 4  ;;  %s5073_s28 = smov [#allocation10]   ;;  %s83_s27 = int_to_ptr.hbm [resolvable:$true] %s82_s27 }
  0x11   :  { %s74_s29 = sshll.u32 %s5073_s28, 4  ;;  %s5074_s2 = smov [#allocation11]   ;;  %s75_s29 = int_to_ptr.vmem [resolvable:$true] %s74_s29 }
  0x12   :  { %77 = dma.hbm_to_vmem [thread:$0]  %s73_s0, 64, %s75_s29, [#allocation9]  }
  0x13   :  { %s84_s30 = sshll.u32 %s5074_s2, 4  ;;  %s5075_s8 = smov 64   ;;  %s85_s30 = int_to_ptr.vmem [resolvable:$true] %s84_s30 }
  0x14   :  { %s5076_s9 = smov 4  }
  0x15   :  { %90 = dma.hbm_to_vmem [thread:$0]  %s83_s27, 4096, %s85_s30, [#allocation12], %s5075_s8, %s5075_s8, %s5076_s9  }
  0x16   :  { %5055 = dma.done.wait [#allocation3], 1792  }
  0x17   :  { %5056 = vsyncadd [#allocation3], 4294965504 }
  0x18   :  { %5057 = dma.done.wait [#allocation6], 25152  }
  0x19   :  { %5058 = vsyncadd [#allocation6], 4294942144 }
  0x1a   :  { %5059 = dma.done.wait [#allocation9], 16448  }
  0x1b   :  { %5060 = vsyncadd [#allocation9], 4294950848 }
  0x1c   :  { %5061 = dma.done.wait [#allocation12], 4096  }
  0x1d   :  { %5062 = vsyncadd [#allocation12], 4294963200  ;;  %v3201_v0 = vld [vmem:[#allocation5 + $0xe0] sm:$0xf]  ;;  %v4545_v1 = vld [vmem:[#allocation5 + $0xec] sm:$0xf0] }
  0x1e   :  { %v3329_v2 = vld [vmem:[#allocation5 + $0x1e0] sm:$0xf]  ;;  %v3202_v3 = vor.u32 %v4545_v1, %v3201_v0  ;;  %v4577_v4 = vld [vmem:[#allocation5 + $0x1ec] sm:$0xf0]  ;;  %vm1325_vm0 = vcmask 130048   ;;  %s5077_s10 = smov [#allocation13]  }
  0x1f   :  { %v3457_v5 = vld [vmem:[#allocation5 + $0x2e0] sm:$0xf]  ;;  %v4609_v6 = vld [vmem:[#allocation5 + $0x2ec] sm:$0xf0]  ;;  %v3330_v7 = vor.u32 %v4577_v4, %v3329_v2  ;;  %s3069_s11 = sshll.u32 %s5077_s10, 4  ;;  %s3071_s14 = sshll.u32 %s5254_s7, 4  ;;  %s3070_s11 = int_to_ptr.vmem [resolvable:$true] %s3069_s11  ;;  %s3072_s14 = int_to_ptr.hbm [resolvable:$true] %s3071_s14 }
  0x20   :  { %v3458_v8 = vor.u32 %v4609_v6, %v3457_v5  ;;  %v3585_v9 = vld [vmem:[#allocation5 + $0x3e0] sm:$0xf]  ;;  %v4641_v10 = vld [vmem:[#allocation5 + $0x3ec] sm:$0xf0]  ;;  %1329 = vmatpush.bf16.msra.mxu0 %v3202_v3  ;;  %s5079_s15 = smov 8  }
  0x21   :  { %v3185_v11 = vld [vmem:[#allocation5 + $0xc0] sm:$0xf]  ;;  %v3586_v12 = vor.u32 %v4641_v10, %v3585_v9  ;;  %v4541_v13 = vld [vmem:[#allocation5 + $0xcc] sm:$0xf0]  ;;  %1343 = vmatpush.bf16.msra.mxu1 %v3330_v7 }
  0x22   :  { %v3313_v14 = vld [vmem:[#allocation5 + $0x1c0] sm:$0xf]  ;;  %v4573_v15 = vld [vmem:[#allocation5 + $0x1cc] sm:$0xf0]  ;;  %1357 = vmatpush.bf16.msra.mxu2 %v3458_v8  ;;  %v3186_v16 = vor.u32 %v4541_v13, %v3185_v11 }
  0x23   :  { %v3314_v17 = vor.u32 %v4573_v15, %v3313_v14  ;;  %v3441_v18 = vld [vmem:[#allocation5 + $0x2c0] sm:$0xf]  ;;  %v4605_v19 = vld [vmem:[#allocation5 + $0x2cc] sm:$0xf0]  ;;  %1371 = vmatpush.bf16.msra.mxu3 %v3586_v12 }
  0x24   :  { %v3569_v20 = vld [vmem:[#allocation5 + $0x3c0] sm:$0xf]  ;;  %v3442_v21 = vor.u32 %v4605_v19, %v3441_v18  ;;  %v4637_v22 = vld [vmem:[#allocation5 + $0x3cc] sm:$0xf0]  ;;  %1330 = vmatpush.bf16.msra.mxu0 %v3186_v16 }
  0x25   :  { %v3169_v23 = vld [vmem:[#allocation5 + $0xa0] sm:$0xf]  ;;  %v4537_v24 = vld [vmem:[#allocation5 + $0xac] sm:$0xf0]  ;;  %v3570_v25 = vor.u32 %v4637_v22, %v3569_v20  ;;  %1344 = vmatpush.bf16.msra.mxu1 %v3314_v17 }
  0x26   :  { %v3297_v26 = vld [vmem:[#allocation5 + $0x1a0] sm:$0xf]  ;;  %v4569_v27 = vld [vmem:[#allocation5 + $0x1ac] sm:$0xf0]  ;;  %v3170_v29 = vor.u32 %v4537_v24, %v3169_v23  ;;  %1358 = vmatpush.bf16.msra.mxu2 %v3442_v21 }
  0x27   :  { %v3425_v28 = vld [vmem:[#allocation5 + $0x2a0] sm:$0xf]  ;;  %v4601_v30 = vld [vmem:[#allocation5 + $0x2ac] sm:$0xf0]  ;;  %v3298_v33 = vor.u32 %v4569_v27, %v3297_v26  ;;  %1372 = vmatpush.bf16.msra.mxu3 %v3570_v25 }
  0x28   :  { %v3553_v31 = vld [vmem:[#allocation5 + $0x3a0] sm:$0xf]  ;;  %v4633_v32 = vld [vmem:[#allocation5 + $0x3ac] sm:$0xf0]  ;;  %v3426_v34 = vor.u32 %v4601_v30, %v3425_v28  ;;  %1331 = vmatpush.bf16.msra.mxu0 %v3170_v29 }
  0x29   :  { %v3153_v35 = vld [vmem:[#allocation5 + $0x80] sm:$0xf]  ;;  %v4533_v36 = vld [vmem:[#allocation5 + $0x8c] sm:$0xf0]  ;;  %v3554_v38 = vor.u32 %v4633_v32, %v3553_v31  ;;  %1345 = vmatpush.bf16.msra.mxu1 %v3298_v33  ;;  %v4543_v32 = vld [vmem:[#allocation5 + $0xe4] sm:$0xf] }
  0x2a   :  { %v3281_v37 = vld [vmem:[#allocation5 + $0x180] sm:$0xf]  ;;  %v4565_v39 = vld [vmem:[#allocation5 + $0x18c] sm:$0xf0]  ;;  %v3154_v44 = vor.u32 %v4533_v36, %v3153_v35  ;;  %1359 = vmatpush.bf16.msra.mxu2 %v3426_v34  ;;  %v3203_v33 = vld [vmem:[#allocation5 + $0xf0] sm:$0xf0] }
  0x2b   :  { %v3409_v40 = vld [vmem:[#allocation5 + $0x280] sm:$0xf]  ;;  %v4597_v41 = vld [vmem:[#allocation5 + $0x28c] sm:$0xf0]  ;;  %v3282_v45 = vor.u32 %v4565_v39, %v3281_v37  ;;  %1373 = vmatpush.bf16.msra.mxu3 %v3554_v38  ;;  %v127_v36 = vld [vmem:[#allocation2 + $0x48] sm:$0xff] }
  0x2c   :  { %v3537_v42 = vld [vmem:[#allocation5 + $0x380] sm:$0xf]  ;;  %v4629_v43 = vld [vmem:[#allocation5 + $0x38c] sm:$0xf0]  ;;  %v3410_v46 = vor.u32 %v4597_v41, %v3409_v40  ;;  %1332 = vmatpush.bf16.msra.mxu0 %v3154_v44  ;;  %v4575_v41 = vld [vmem:[#allocation5 + $0x1e4] sm:$0xf] }
  0x2d   :  { %v3137_v47 = vld [vmem:[#allocation5 + $0x60] sm:$0xf]  ;;  %v4529_v48 = vld [vmem:[#allocation5 + $0x6c] sm:$0xf0]  ;;  %v3538_v50 = vor.u32 %v4629_v43, %v3537_v42  ;;  %1346 = vmatpush.bf16.msra.mxu1 %v3282_v45  ;;  %v125_v43 = vld [vmem:[#allocation2 + $0x38] sm:$0xff] }
  0x2e   :  { %v3265_v49 = vld [vmem:[#allocation5 + $0x160] sm:$0xf]  ;;  %v4561_v51 = vld [vmem:[#allocation5 + $0x16c] sm:$0xf0]  ;;  %v3138_v56 = vor.u32 %v4529_v48, %v3137_v47  ;;  %1360 = vmatpush.bf16.msra.mxu2 %v3410_v46  ;;  %v3331_v46 = vld [vmem:[#allocation5 + $0x1f0] sm:$0xf0] }
  0x2f   :  { %v3393_v52 = vld [vmem:[#allocation5 + $0x260] sm:$0xf]  ;;  %v4593_v53 = vld [vmem:[#allocation5 + $0x26c] sm:$0xf0]  ;;  %v3266_v57 = vor.u32 %v4561_v51, %v3265_v49  ;;  %1374 = vmatpush.bf16.msra.mxu3 %v3538_v50  ;;  %v121_v47 = vld [vmem:[#allocation2 + $0x18] sm:$0xff]  ;;  %v3206_v50 = vor.u32 %v4543_v32, %v3203_v33 }
  0x30   :  { %v3521_v54 = vld [vmem:[#allocation5 + $0x360] sm:$0xf]  ;;  %v4625_v55 = vld [vmem:[#allocation5 + $0x36c] sm:$0xf0]  ;;  %v3394_v58 = vor.u32 %v4593_v53, %v3393_v52  ;;  %1333 = vmatpush.bf16.msra.mxu0 %v3138_v56 }
  0x31   :  { %v3121_v59 = vld [vmem:[#allocation5 + $0x40] sm:$0xf]  ;;  %v4525_v60 = vld [vmem:[#allocation5 + $0x4c] sm:$0xf0]  ;;  %v3522_v62 = vor.u32 %v4625_v55, %v3521_v54  ;;  %1347 = vmatpush.bf16.msra.mxu1 %v3266_v57  ;;  %v4539_v57 = vld [vmem:[#allocation5 + $0xc4] sm:$0xf] }
  0x32   :  { %v3249_v61 = vld [vmem:[#allocation5 + $0x140] sm:$0xf]  ;;  %v4557_v63 = vld [vmem:[#allocation5 + $0x14c] sm:$0xf0]  ;;  %v3122_v4 = vor.u32 %v4525_v60, %v3121_v59  ;;  %1361 = vmatpush.bf16.msra.mxu2 %v3394_v58  ;;  %v3187_v58 = vld [vmem:[#allocation5 + $0xd0] sm:$0xf0] }
  0x33   :  { %v3377_v0 = vld [vmem:[#allocation5 + $0x240] sm:$0xf]  ;;  %v4589_v1 = vld [vmem:[#allocation5 + $0x24c] sm:$0xf0]  ;;  %v3250_v6 = vor.u32 %v4557_v63, %v3249_v61  ;;  %1375 = vmatpush.bf16.msra.mxu3 %v3522_v62  ;;  %v119_v61 = vld [vmem:[#allocation2 + $0x8] sm:$0xff]  ;;  %v3334_v63 = vor.u32 %v4575_v41, %v3331_v46 }
  0x34   :  { %v3505_v2 = vld [vmem:[#allocation5 + $0x340] sm:$0xf]  ;;  %v4621_v3 = vld [vmem:[#allocation5 + $0x34c] sm:$0xf0]  ;;  %v3378_v7 = vor.u32 %v4589_v1, %v3377_v0  ;;  %1334 = vmatpush.bf16.msra.mxu0 %v3122_v4  ;;  %v4571_v1 = vld [vmem:[#allocation5 + $0x1c4] sm:$0xf]  ;;  %v3190_v4 = vor.u32 %v4539_v57, %v3187_v58 }
  0x35   :  { %v3105_v5 = vld [vmem:[#allocation5 + $0x20] sm:$0xf]  ;;  %v4521_v8 = vld [vmem:[#allocation5 + $0x2c] sm:$0xf0]  ;;  %v3506_v11 = vor.u32 %v4621_v3, %v3505_v2  ;;  %1348 = vmatpush.bf16.msra.mxu1 %v3250_v6  ;;  %v3315_v2 = vld [vmem:[#allocation5 + $0x1d0] sm:$0xf0] }
  0x36   :  { %v3233_v9 = vld [vmem:[#allocation5 + $0x120] sm:$0xf]  ;;  %v4553_v10 = vld [vmem:[#allocation5 + $0x12c] sm:$0xf0]  ;;  %v3106_v18 = vor.u32 %v4521_v8, %v3105_v5  ;;  %1362 = vmatpush.bf16.msra.mxu2 %v3378_v7  ;;  %v3267_v41 = vld [vmem:[#allocation5 + $0x170] sm:$0xf0] }
  0x37   :  { %v3361_v12 = vld [vmem:[#allocation5 + $0x220] sm:$0xf]  ;;  %v4585_v13 = vld [vmem:[#allocation5 + $0x22c] sm:$0xf0]  ;;  %v3234_v23 = vor.u32 %v4553_v10, %v3233_v9  ;;  %1376 = vmatpush.bf16.msra.mxu3 %v3506_v11  ;;  %v4535_v10 = vld [vmem:[#allocation5 + $0xa4] sm:$0xf] }
  0x38   :  { %v3489_v14 = vld [vmem:[#allocation5 + $0x320] sm:$0xf]  ;;  %v4617_v15 = vld [vmem:[#allocation5 + $0x32c] sm:$0xf0]  ;;  %v3362_v24 = vor.u32 %v4585_v13, %v3361_v12  ;;  %1335 = vmatpush.bf16.msra.mxu0 %v3106_v18  ;;  %v3171_v11 = vld [vmem:[#allocation5 + $0xb0] sm:$0xf0]  ;;  %v3318_v12 = vor.u32 %v4571_v1, %v3315_v2 }
  0x39   :  { %v3089_v16 = vld [vmem:[#allocation5] sm:$0xf]  ;;  %v4517_v17 = vld [vmem:[#allocation5 + $0xc] sm:$0xf0]  ;;  %v3490_v28 = vor.u32 %v4617_v15, %v3489_v14  ;;  %1349 = vmatpush.bf16.msra.mxu1 %v3234_v23  ;;  %v4567_v14 = vld [vmem:[#allocation5 + $0x1a4] sm:$0xf] }
  0x3a   :  { %v3217_v19 = vld [vmem:[#allocation5 + $0x100] sm:$0xf]  ;;  %v4549_v20 = vld [vmem:[#allocation5 + $0x10c] sm:$0xf0]  ;;  %v3090_v35 = vor.u32 %v4517_v17, %v3089_v16  ;;  %1363 = vmatpush.bf16.msra.mxu2 %v3362_v24  ;;  %v3299_v15 = vld [vmem:[#allocation5 + $0x1b0] sm:$0xf0]  ;;  %v3174_v17 = vor.u32 %v4535_v10, %v3171_v11 }
  0x3b   :  { %v3345_v21 = vld [vmem:[#allocation5 + $0x200] sm:$0xf]  ;;  %v4581_v22 = vld [vmem:[#allocation5 + $0x20c] sm:$0xf0]  ;;  %v3218_v39 = vor.u32 %v4549_v20, %v3217_v19  ;;  %1377 = vmatpush.bf16.msra.mxu3 %v3490_v28  ;;  %v3155_v23 = vld [vmem:[#allocation5 + $0x90] sm:$0xf0]  ;;  %v3302_v24 = vor.u32 %v4567_v14, %v3299_v15 }
  0x3c   :  { %v3473_v25 = vld [vmem:[#allocation5 + $0x300] sm:$0xf]  ;;  %v4613_v26 = vld [vmem:[#allocation5 + $0x30c] sm:$0xf0]  ;;  %v3346_v40 = vor.u32 %v4581_v22, %v3345_v21  ;;  %1336 = vmatpush.bf16.msra.mxu0 %v3090_v35  ;;  %v4531_v22 = vld [vmem:[#allocation5 + $0x84] sm:$0xf] }
  0x3d   :  { %v3713_v27 = vld [vmem:[#allocation5 + $0x4e0] sm:$0xf]  ;;  %v4673_v29 = vld [vmem:[#allocation5 + $0x4ec] sm:$0xf0]  ;;  %v3474_v44 = vor.u32 %v4613_v26, %v3473_v25  ;;  %1350 = vmatpush.bf16.msra.mxu1 %v3218_v39  ;;  %v4563_v26 = vld [vmem:[#allocation5 + $0x184] sm:$0xf] }
  0x3e   :  { %v3841_v30 = vld [vmem:[#allocation5 + $0x5e0] sm:$0xf]  ;;  %v4705_v31 = vld [vmem:[#allocation5 + $0x5ec] sm:$0xf0]  ;;  %v3714_v45 = vor.u32 %v4673_v29, %v3713_v27  ;;  %1364 = vmatpush.bf16.msra.mxu2 %v3346_v40  ;;  %v3283_v27 = vld [vmem:[#allocation5 + $0x190] sm:$0xf0]  ;;  %v3158_v29 = vor.u32 %v4531_v22, %v3155_v23 }
  0x3f   :  { %v120_v34 = vld [vmem:[#allocation2 + $0x10] sm:$0xff]  ;;  %v4709_v38 = vld [vmem:[#allocation5 + $0x60c] sm:$0xf0]  ;;  %v3842_v49 = vor.u32 %v4705_v31, %v3841_v30  ;;  %1378 = vmatpush.bf16.msra.mxu3 %v3474_v44  ;;  %v3139_v35 = vld [vmem:[#allocation5 + $0x70] sm:$0xf0] }
  0x40   :  { %v3857_v37 = vld [vmem:[#allocation5 + $0x600] sm:$0xf]  ;;  %v118_v42 = vld [vmem:[#allocation2] sm:$0xff]  ;;  %v5138_v54 = vpack.c.bf16 %v127_v36, %v120_v34  ;;  %1385 = vmatpush.bf16.msrb.mxu0 %v3714_v45  ;;  %v4527_v34 = vld [vmem:[#allocation5 + $0x64] sm:$0xf] }
  0x41   :  { %v128_v48 = vld [vmem:[#allocation2 + $0x50] sm:$0xff]  ;;  %v4669_v52 = vld [vmem:[#allocation5 + $0x4cc] sm:$0xf0]  ;;  %v5140_v55 = vpack.c.bf16 %v125_v43, %v118_v42  ;;  %v3858_v59 = vor.u32 %v4709_v38, %v3857_v37  ;;  %1399 = vmatpush.bf16.msrb.mxu1 %v3842_v49  ;;  %v131_v37 = vld [vmem:[#allocation2 + $0x68] sm:$0xff]  ;;  %v3286_v38 = vor.u32 %v4563_v26, %v3283_v27  ;;  %v3142_v43 = vor.u32 %v4527_v34, %v3139_v35 }
  0x42   :  { %v3697_v51 = vld [vmem:[#allocation5 + $0x4c0] sm:$0xf]  ;;  %v4701_v56 = vld [vmem:[#allocation5 + $0x5cc] sm:$0xf0]  ;;  %v5142_v60 = vpack.c.bf16 %v128_v48, %v121_v47  ;;  %1365 = vmatmul.bf16.vlgmr.msra.gmra.mxu2 %v5138_v54  ;;  %v4559_v40 = vld [vmem:[#allocation5 + $0x164] sm:$0xf] }
  0x43   :  { %v3825_v53 = vld [vmem:[#allocation5 + $0x5c0] sm:$0xf]  ;;  %v126_v62 = vld [vmem:[#allocation2 + $0x40] sm:$0xff]  ;;  %v3698_v0 = vor.u32 %v4669_v52, %v3697_v51  ;;  %1427 = vmatpush.bf16.msrb.mxu3 %v3206_v50  ;;  %1337 = vmatmul.bf16.vlgmr.msra.gmra.mxu0 %v5140_v55  ;;  %v4523_v48 = vld [vmem:[#allocation5 + $0x44] sm:$0xf]  ;;  %v3270_v51 = vor.u32 %v4559_v40, %v3267_v41 }
  0x44   :  { %v3826_v3 = vor.u32 %v4701_v56, %v3825_v53  ;;  %v3681_v5 = vld [vmem:[#allocation5 + $0x4a0] sm:$0xf]  ;;  %v4665_v6 = vld [vmem:[#allocation5 + $0x4ac] sm:$0xf0]  ;;  %v5146_v8 = vpack.c.bf16 %v126_v62, %v119_v61  ;;  %1420 = vmatpush.bf16.msrb.mxu2 %v3858_v59  ;;  %1379 = vmatmul.bf16.vlgmr.msra.gmra.mxu3 %v5142_v60  ;;  %v3123_v49 = vld [vmem:[#allocation5 + $0x50] sm:$0xf0] }
  0x45   :  { %v3809_v7 = vld [vmem:[#allocation5 + $0x5a0] sm:$0xf]  ;;  %v4697_v9 = vld [vmem:[#allocation5 + $0x5ac] sm:$0xf0]  ;;  %1386 = vmatpush.bf16.msrb.mxu0 %v3698_v0  ;;  %v3682_v13 = vor.u32 %v4665_v6, %v3681_v5  ;;  %v4555_v53 = vld [vmem:[#allocation5 + $0x144] sm:$0xf]  ;;  %v3126_v58 = vor.u32 %v4523_v48, %v3123_v49 }
  0x46   :  { %1400 = vmatpush.bf16.msrb.mxu1 %v3826_v3  ;;  %v3810_v16 = vor.u32 %v4697_v9, %v3809_v7  ;;  %v3665_v18 = vld [vmem:[#allocation5 + $0x480] sm:$0xf]  ;;  %v4661_v19 = vld [vmem:[#allocation5 + $0x48c] sm:$0xf0]  ;;  %v3251_v56 = vld [vmem:[#allocation5 + $0x150] sm:$0xf0] }
  0x47   :  { %1428 = vmatpush.bf16.msrb.mxu3 %v3190_v4  ;;  %v3793_v20 = vld [vmem:[#allocation5 + $0x580] sm:$0xf]  ;;  %1351 = vmatmul.bf16.vlgmr.msra.gmra.mxu1 %v5146_v8  ;;  %v4693_v21 = vld [vmem:[#allocation5 + $0x58c] sm:$0xf0]  ;;  %v3666_v25 = vor.u32 %v4661_v19, %v3665_v18  ;;  %v4519_v0 = vld [vmem:[#allocation5 + $0x24] sm:$0xf]  ;;  %v3254_v4 = vor.u32 %v4555_v53, %v3251_v56 }
  0x48   :  { %1441 = vmatpush.bf16.msra.mxu2 %v3334_v63  ;;  %v3794_v28 = vor.u32 %v4693_v21, %v3793_v20  ;;  %v3649_v30 = vld [vmem:[#allocation5 + $0x460] sm:$0xf]  ;;  %v4657_v31 = vld [vmem:[#allocation5 + $0x46c] sm:$0xf0]  ;;  %v3107_v1 = vld [vmem:[#allocation5 + $0x30] sm:$0xf0] }
  0x49   :  { %1387 = vmatpush.bf16.msrb.mxu0 %v3682_v13  ;;  %v3777_v32 = vld [vmem:[#allocation5 + $0x560] sm:$0xf]  ;;  %v4689_v33 = vld [vmem:[#allocation5 + $0x56c] sm:$0xf0]  ;;  %v3650_v39 = vor.u32 %v4657_v31, %v3649_v30  ;;  %v4551_v2 = vld [vmem:[#allocation5 + $0x124] sm:$0xf]  ;;  %v3110_v11 = vor.u32 %v4519_v0, %v3107_v1 }
  0x4a   :  { %1401 = vmatpush.bf16.msrb.mxu1 %v3810_v16  ;;  %v124_v36 = vld [vmem:[#allocation2 + $0x30] sm:$0xff]  ;;  %v3778_v42 = vor.u32 %v4689_v33, %v3777_v32  ;;  %v4653_v45 = vld [vmem:[#allocation5 + $0x44c] sm:$0xf0]  ;;  %v3235_v3 = vld [vmem:[#allocation5 + $0x130] sm:$0xf0] }
  0x4b   :  { %1429 = vmatpush.bf16.msrb.mxu3 %v3174_v17  ;;  %v3633_v44 = vld [vmem:[#allocation5 + $0x440] sm:$0xf]  ;;  %v4685_v47 = vld [vmem:[#allocation5 + $0x54c] sm:$0xf0]  ;;  %v5150_v50 = vpack.c.bf16 %v131_v37, %v124_v36  ;;  %v4515_v13 = vld [vmem:[#allocation5 + $0x4] sm:$0xf]  ;;  %v3238_v21 = vor.u32 %v4551_v2, %v3235_v3 }
  0x4c   :  { %1442 = vmatpush.bf16.msra.mxu2 %v3318_v12  ;;  %v3761_v46 = vld [vmem:[#allocation5 + $0x540] sm:$0xf]  ;;  %v3634_v52 = vor.u32 %v4653_v45, %v3633_v44  ;;  %v4649_v61 = vld [vmem:[#allocation5 + $0x42c] sm:$0xf0]  ;;  %v3091_v14 = vld [vmem:[#allocation5 + $0x10] sm:$0xf0] }
  0x4d   :  { %1388 = vmatpush.bf16.msrb.mxu0 %v3666_v25  ;;  %v3762_v57 = vor.u32 %v4685_v47, %v3761_v46  ;;  %v3617_v59 = vld [vmem:[#allocation5 + $0x420] sm:$0xf]  ;;  %v4681_v63 = vld [vmem:[#allocation5 + $0x52c] sm:$0xf0]  ;;  %v4607_v15 = vld [vmem:[#allocation5 + $0x2e4] sm:$0xf]  ;;  %v3094_v27 = vor.u32 %v4515_v13, %v3091_v14 }
  0x4e   :  { %1402 = vmatpush.bf16.msrb.mxu1 %v3794_v28  ;;  %v3745_v62 = vld [vmem:[#allocation5 + $0x520] sm:$0xf]  ;;  %v3618_v5 = vor.u32 %v4649_v61, %v3617_v59  ;;  %v4645_v7 = vld [vmem:[#allocation5 + $0x40c] sm:$0xf0]  ;;  %v3459_v16 = vld [vmem:[#allocation5 + $0x2f0] sm:$0xf0] }
  0x4f   :  { %1430 = vmatpush.bf16.msrb.mxu3 %v3158_v29  ;;  %v3601_v6 = vld [vmem:[#allocation5 + $0x400] sm:$0xf]  ;;  %v3746_v10 = vor.u32 %v4681_v63, %v3745_v62  ;;  %v4677_v12 = vld [vmem:[#allocation5 + $0x50c] sm:$0xf0]  ;;  %v4639_v17 = vld [vmem:[#allocation5 + $0x3e4] sm:$0xf]  ;;  %v3462_v31 = vor.u32 %v4607_v15, %v3459_v16 }
  0x50   :  { %1443 = vmatpush.bf16.msra.mxu2 %v3302_v24  ;;  %v3729_v9 = vld [vmem:[#allocation5 + $0x500] sm:$0xf]  ;;  %v3587_v18 = vld [vmem:[#allocation5 + $0x3f0] sm:$0xf0]  ;;  %v4671_v19 = vld [vmem:[#allocation5 + $0x4e4] sm:$0xf]  ;;  %v3602_v22 = vor.u32 %v4645_v7, %v3601_v6 }
  0x51   :  { %1389 = vmatpush.bf16.msrb.mxu0 %v3650_v39  ;;  %v3715_v20 = vld [vmem:[#allocation5 + $0x4f0] sm:$0xf0]  ;;  %v129_v24 = vld [vmem:[#allocation2 + $0x58] sm:$0xff]  ;;  %v4547_v25 = vld [vmem:[#allocation5 + $0x104] sm:$0xf]  ;;  %v3730_v26 = vor.u32 %v4677_v12, %v3729_v9  ;;  %v3590_v32 = vor.u32 %v4639_v17, %v3587_v18 }
  0x52   :  { %1403 = vmatpush.bf16.msrb.mxu1 %v3778_v42  ;;  %3871 = vmatmul.msk.bf16.vlgmr.msrb.gmra.mxu2 %vm1325_vm0, %v5150_v50  ;;  %v122_v23 = vld [vmem:[#allocation2 + $0x20] sm:$0xff]  ;;  %v123_v29 = vld [vmem:[#allocation2 + $0x28] sm:$0xff]  ;;  %v4703_v33 = vld [vmem:[#allocation5 + $0x5e4] sm:$0xf]  ;;  %v3718_v36 = vor.u32 %v4671_v19, %v3715_v20 }
  0x53   :  { %1431 = vmatpush.bf16.msrb.mxu3 %v3142_v43  ;;  %v3219_v28 = vld [vmem:[#allocation5 + $0x110] sm:$0xf0]  ;;  %v4603_v35 = vld [vmem:[#allocation5 + $0x2c4] sm:$0xf]  ;;  %v5154_v37 = vpack.c.bf16 %v129_v24, %v122_v23 }
  0x54   :  { %1444 = vmatpush.bf16.msra.mxu2 %v3286_v38  ;;  %v130_v30 = vld [vmem:[#allocation2 + $0x60] sm:$0xff]  ;;  %v4635_v39 = vld [vmem:[#allocation5 + $0x3c4] sm:$0xf]  ;;  %v3222_v41 = vor.u32 %v4547_v25, %v3219_v28 }
  0x55   :  { %1390 = vmatpush.bf16.msrb.mxu0 %v3634_v52  ;;  %v3843_v34 = vld [vmem:[#allocation5 + $0x5f0] sm:$0xf0]  ;;  %v5156_v42 = vpack.c.bf16 %v130_v30, %v123_v29  ;;  %v4667_v43 = vld [vmem:[#allocation5 + $0x4c4] sm:$0xf] }
  0x56   :  { %1404 = vmatpush.bf16.msrb.mxu1 %v3762_v57  ;;  %v3443_v38 = vld [vmem:[#allocation5 + $0x2d0] sm:$0xf0]  ;;  %v3846_v45 = vor.u32 %v4703_v33, %v3843_v34  ;;  %v4699_v48 = vld [vmem:[#allocation5 + $0x5c4] sm:$0xf] }
  0x57   :  { %1432 = vmatpush.bf16.msrb.mxu3 %v3126_v58  ;;  %v3571_v40 = vld [vmem:[#allocation5 + $0x3d0] sm:$0xf0]  ;;  %v3446_v46 = vor.u32 %v4603_v35, %v3443_v38  ;;  %v4631_v56 = vld [vmem:[#allocation5 + $0x3a4] sm:$0xf] }
  0x58   :  { %1445 = vmatpush.bf16.msra.mxu2 %v3270_v51  ;;  %v3699_v44 = vld [vmem:[#allocation5 + $0x4d0] sm:$0xf0]  ;;  %v3574_v47 = vor.u32 %v4635_v39, %v3571_v40  ;;  %v4599_v51 = vld [vmem:[#allocation5 + $0x2a4] sm:$0xf] }
  0x59   :  { %1391 = vmatpush.bf16.msrb.mxu0 %v3618_v5  ;;  %v3827_v49 = vld [vmem:[#allocation5 + $0x5d0] sm:$0xf0]  ;;  %v3702_v52 = vor.u32 %v4667_v43, %v3699_v44  ;;  %v4663_v58 = vld [vmem:[#allocation5 + $0x4a4] sm:$0xf] }
  0x5a   :  { %1405 = vmatpush.bf16.msrb.mxu1 %v3746_v10  ;;  %v3427_v53 = vld [vmem:[#allocation5 + $0x2b0] sm:$0xf0]  ;;  %v3830_v61 = vor.u32 %v4699_v48, %v3827_v49  ;;  %v4695_v0 = vld [vmem:[#allocation5 + $0x5a4] sm:$0xf] }
  0x5b   :  { %1433 = vmatpush.bf16.msrb.mxu3 %v3110_v11  ;;  %v3555_v57 = vld [vmem:[#allocation5 + $0x3b0] sm:$0xf0]  ;;  %v3430_v62 = vor.u32 %v4599_v51, %v3427_v53  ;;  %v4595_v2 = vld [vmem:[#allocation5 + $0x284] sm:$0xf] }
  0x5c   :  { %1446 = vmatpush.bf16.msra.mxu2 %v3254_v4  ;;  %v3683_v59 = vld [vmem:[#allocation5 + $0x4b0] sm:$0xf0]  ;;  %v3558_v63 = vor.u32 %v4631_v56, %v3555_v57  ;;  %v4627_v5 = vld [vmem:[#allocation5 + $0x384] sm:$0xf] }
  0x5d   :  { %1392 = vmatpush.bf16.msrb.mxu0 %v3602_v22  ;;  %v3811_v1 = vld [vmem:[#allocation5 + $0x5b0] sm:$0xf0]  ;;  %v3686_v3 = vor.u32 %v4663_v58, %v3683_v59  ;;  %v4659_v7 = vld [vmem:[#allocation5 + $0x484] sm:$0xf] }
  0x5e   :  { %1406 = vmatpush.bf16.msrb.mxu1 %v3730_v26  ;;  %v3411_v4 = vld [vmem:[#allocation5 + $0x290] sm:$0xf0]  ;;  %v3814_v10 = vor.u32 %v4695_v0, %v3811_v1  ;;  %v4691_v13 = vld [vmem:[#allocation5 + $0x584] sm:$0xf]  ;;  %v3209_v0 = vld [vmem:[#allocation5 + $0xe8] sm:$0xf] }
  0x5f   :  { %1434 = vmatpush.bf16.msrb.mxu3 %v3094_v27  ;;  %v3539_v6 = vld [vmem:[#allocation5 + $0x390] sm:$0xf0]  ;;  %v3414_v11 = vor.u32 %v4595_v2, %v3411_v4  ;;  %v4591_v15 = vld [vmem:[#allocation5 + $0x264] sm:$0xf]  ;;  %v4546_v1 = vld [vmem:[#allocation5 + $0xf4] sm:$0xf0] }
  0x60   :  { %1447 = vmatpush.bf16.msra.mxu2 %v3238_v21  ;;  %1393 = vmatmul.bf16.vlgmr.msrb.gmra.mxu0 %v5154_v37  ;;  %v3667_v9 = vld [vmem:[#allocation5 + $0x490] sm:$0xf0]  ;;  %v3542_v12 = vor.u32 %v4627_v5, %v3539_v6  ;;  %v4623_v18 = vld [vmem:[#allocation5 + $0x364] sm:$0xf]  ;;  %v3465_v5 = vld [vmem:[#allocation5 + $0x2e8] sm:$0xf] }
  0x61   :  { %1455 = vmatpush.bf16.msra.mxu0 %v3462_v31  ;;  %1407 = vmatmul.bf16.vlgmr.msrb.gmra.mxu1 %v5156_v42  ;;  %v3795_v14 = vld [vmem:[#allocation5 + $0x590] sm:$0xf0]  ;;  %v3670_v16 = vor.u32 %v4659_v7, %v3667_v9  ;;  %v4655_v20 = vld [vmem:[#allocation5 + $0x464] sm:$0xf]  ;;  %v4610_v6 = vld [vmem:[#allocation5 + $0x2f4] sm:$0xf0] }
  0x62   :  { %1469 = vmatpush.bf16.msra.mxu1 %v3590_v32  ;;  %1435 = vmatmul.bf16.vlgmr.msrb.gmra.mxu3 %v5140_v55  ;;  %v3395_v17 = vld [vmem:[#allocation5 + $0x270] sm:$0xf0]  ;;  %v3798_v22 = vor.u32 %v4691_v13, %v3795_v14  ;;  %v4687_v25 = vld [vmem:[#allocation5 + $0x564] sm:$0xf]  ;;  %v3210_v13 = vor.u32 %v4546_v1, %v3209_v0  ;;  %v3593_v14 = vld [vmem:[#allocation5 + $0x3e8] sm:$0xf] }
  0x63   :  { %1483 = vmatpush.bf16.msra.mxu3 %v3718_v36  ;;  %v3523_v19 = vld [vmem:[#allocation5 + $0x370] sm:$0xf0]  ;;  %v3398_v23 = vor.u32 %v4591_v15, %v3395_v17  ;;  %v4587_v27 = vld [vmem:[#allocation5 + $0x244] sm:$0xf]  ;;  %v4642_v15 = vld [vmem:[#allocation5 + $0x3f4] sm:$0xf0] }
  0x64   :  { %1448 = vmatpush.bf16.msra.mxu2 %v3222_v41  ;;  %v3651_v21 = vld [vmem:[#allocation5 + $0x470] sm:$0xf0]  ;;  %v3526_v24 = vor.u32 %v4623_v18, %v3523_v19  ;;  %v4619_v30 = vld [vmem:[#allocation5 + $0x344] sm:$0xf]  ;;  %v3337_v17 = vld [vmem:[#allocation5 + $0x1e8] sm:$0xf]  ;;  %v3466_v19 = vor.u32 %v4610_v6, %v3465_v5 }
  0x65   :  { %1456 = vmatpush.bf16.msra.mxu0 %v3446_v46  ;;  %v3779_v26 = vld [vmem:[#allocation5 + $0x570] sm:$0xf0]  ;;  %v3654_v28 = vor.u32 %v4655_v20, %v3651_v21  ;;  %v4651_v32 = vld [vmem:[#allocation5 + $0x444] sm:$0xf]  ;;  %v4578_v18 = vld [vmem:[#allocation5 + $0x1f4] sm:$0xf0] }
  0x66   :  { %1470 = vmatpush.bf16.msra.mxu1 %v3574_v47  ;;  %v3379_v29 = vld [vmem:[#allocation5 + $0x250] sm:$0xf0]  ;;  %v3782_v34 = vor.u32 %v4687_v25, %v3779_v26  ;;  %v4683_v38 = vld [vmem:[#allocation5 + $0x544] sm:$0xf]  ;;  %v3193_v21 = vld [vmem:[#allocation5 + $0xc8] sm:$0xf]  ;;  %v3338_v26 = vor.u32 %v4578_v18, %v3337_v17 }
  0x67   :  { %1484 = vmatpush.bf16.msra.mxu3 %v3702_v52  ;;  %1449 = vmatmul.bf16.vlgmr.msra.gmra.mxu2 %v5146_v8  ;;  %v3507_v31 = vld [vmem:[#allocation5 + $0x350] sm:$0xf0]  ;;  %v3382_v35 = vor.u32 %v4587_v27, %v3379_v29  ;;  %v4583_v40 = vld [vmem:[#allocation5 + $0x224] sm:$0xf]  ;;  %v4606_v25 = vld [vmem:[#allocation5 + $0x2d4] sm:$0xf0] }
  0x68   :  { %1497 = vmatpush.bf16.msrb.mxu2 %v3846_v45  ;;  %v3635_v33 = vld [vmem:[#allocation5 + $0x450] sm:$0xf0]  ;;  %v3510_v36 = vor.u32 %v4619_v30, %v3507_v31  ;;  %v4615_v44 = vld [vmem:[#allocation5 + $0x324] sm:$0xf]  ;;  %v3577_v27 = vld [vmem:[#allocation5 + $0x3c8] sm:$0xf] }
  0x69   :  { %1457 = vmatpush.bf16.msra.mxu0 %v3430_v62  ;;  %v3763_v39 = vld [vmem:[#allocation5 + $0x550] sm:$0xf0]  ;;  %v3638_v41 = vor.u32 %v4651_v32, %v3635_v33  ;;  %v4647_v46 = vld [vmem:[#allocation5 + $0x424] sm:$0xf]  ;;  %v3321_v30 = vld [vmem:[#allocation5 + $0x1c8] sm:$0xf] }
  0x6a   :  { %1471 = vmatpush.bf16.msra.mxu1 %v3558_v63  ;;  %v3363_v43 = vld [vmem:[#allocation5 + $0x230] sm:$0xf0]  ;;  %v3766_v48 = vor.u32 %v4683_v38, %v3763_v39  ;;  %v4679_v49 = vld [vmem:[#allocation5 + $0x524] sm:$0xf]  ;;  %v4574_v31 = vld [vmem:[#allocation5 + $0x1d4] sm:$0xf0] }
  0x6b   :  { %1485 = vmatpush.bf16.msra.mxu3 %v3686_v3  ;;  %v3491_v45 = vld [vmem:[#allocation5 + $0x330] sm:$0xf0]  ;;  %v3366_v52 = vor.u32 %v4583_v40, %v3363_v43  ;;  %v4579_v56 = vld [vmem:[#allocation5 + $0x204] sm:$0xf]  ;;  %v3177_v33 = vld [vmem:[#allocation5 + $0xa8] sm:$0xf]  ;;  %v3322_v39 = vor.u32 %v4574_v31, %v3321_v30 }
  0x6c   :  { %1498 = vmatpush.bf16.msrb.mxu2 %v3830_v61  ;;  %v3619_v47 = vld [vmem:[#allocation5 + $0x430] sm:$0xf0]  ;;  %v3494_v53 = vor.u32 %v4615_v44, %v3491_v45  ;;  %v4611_v58 = vld [vmem:[#allocation5 + $0x304] sm:$0xf]  ;;  %v4602_v38 = vld [vmem:[#allocation5 + $0x2b4] sm:$0xf0] }
  0x6d   :  { %1458 = vmatpush.bf16.msra.mxu0 %v3414_v11  ;;  %v3747_v51 = vld [vmem:[#allocation5 + $0x530] sm:$0xf0]  ;;  %v3622_v59 = vor.u32 %v4647_v46, %v3619_v47  ;;  %v4643_v62 = vld [vmem:[#allocation5 + $0x404] sm:$0xf]  ;;  %v3561_v40 = vld [vmem:[#allocation5 + $0x3a8] sm:$0xf] }
  0x6e   :  { %1472 = vmatpush.bf16.msra.mxu1 %v3542_v12  ;;  %v3347_v57 = vld [vmem:[#allocation5 + $0x210] sm:$0xf0]  ;;  %v4707_v2 = vld [vmem:[#allocation5 + $0x604] sm:$0xf]  ;;  %v3750_v3 = vor.u32 %v4679_v49, %v3747_v51  ;;  %v3305_v44 = vld [vmem:[#allocation5 + $0x1a8] sm:$0xf] }
  0x6f   :  { %1486 = vmatpush.bf16.msra.mxu3 %v3670_v16  ;;  %v3475_v61 = vld [vmem:[#allocation5 + $0x310] sm:$0xf0]  ;;  %v3350_v7 = vor.u32 %v4579_v56, %v3347_v57  ;;  %v4570_v45 = vld [vmem:[#allocation5 + $0x1b4] sm:$0xf0]  ;;  %v3161_v47 = vld [vmem:[#allocation5 + $0x88] sm:$0xf] }
  0x70   :  { %1499 = vmatpush.bf16.msrb.mxu2 %v3814_v10  ;;  %v3603_v63 = vld [vmem:[#allocation5 + $0x410] sm:$0xf0]  ;;  %v3478_v9 = vor.u32 %v4611_v58, %v3475_v61  ;;  %v4675_v10 = vld [vmem:[#allocation5 + $0x504] sm:$0xf]  ;;  %v3417_v51 = vld [vmem:[#allocation5 + $0x288] sm:$0xf] }
  0x71   :  { %1459 = vmatpush.bf16.msra.mxu0 %v3398_v23  ;;  %v3859_v4 = vld [vmem:[#allocation5 + $0x610] sm:$0xf0]  ;;  %v3606_v12 = vor.u32 %v4643_v62, %v3603_v63  ;;  %v3594_v23 = vor.u32 %v4642_v15, %v3593_v14  ;;  %v3545_v56 = vld [vmem:[#allocation5 + $0x388] sm:$0xf]  ;;  %v4630_v57 = vld [vmem:[#allocation5 + $0x394] sm:$0xf0] }
  0x72   :  { %1473 = vmatpush.bf16.msra.mxu1 %v3526_v24  ;;  %v3731_v11 = vld [vmem:[#allocation5 + $0x510] sm:$0xf0]  ;;  %v3862_v16 = vor.u32 %v4707_v2, %v3859_v4  ;;  %v3449_v24 = vld [vmem:[#allocation5 + $0x2c8] sm:$0xf]  ;;  %v4566_v61 = vld [vmem:[#allocation5 + $0x194] sm:$0xf0]  ;;  %v3546_v1 = vor.u32 %v4630_v57, %v3545_v56 }
  0x73   :  { %1487 = vmatpush.bf16.msra.mxu3 %v3654_v28  ;;  %v3734_v20 = vor.u32 %v4675_v10, %v3731_v11  ;;  %v4638_v28 = vld [vmem:[#allocation5 + $0x3d4] sm:$0xf0]  ;;  %v3450_v32 = vor.u32 %v4606_v25, %v3449_v24  ;;  %v3145_v63 = vld [vmem:[#allocation5 + $0x68] sm:$0xf]  ;;  %v4544_v56 = vld [vmem:[#allocation5 + $0xec] sm:$0xf] }
  0x74   :  { %1500 = vmatpush.bf16.msrb.mxu2 %v3798_v22  ;;  %v4542_v22 = vld [vmem:[#allocation5 + $0xd4] sm:$0xf0]  ;;  %v3401_v2 = vld [vmem:[#allocation5 + $0x268] sm:$0xf]  ;;  %v3211_v57 = vld [vmem:[#allocation5 + $0xf8] sm:$0xf0] }
  0x75   :  { %1460 = vmatpush.bf16.msra.mxu0 %v3382_v35  ;;  %v3194_v29 = vor.u32 %v4542_v22, %v3193_v21  ;;  %v3578_v35 = vor.u32 %v4638_v28, %v3577_v27  ;;  %v4530_v0 = vld [vmem:[#allocation5 + $0x74] sm:$0xf0]  ;;  %v3529_v5 = vld [vmem:[#allocation5 + $0x368] sm:$0xf] }
  0x76   :  { %1474 = vmatpush.bf16.msra.mxu1 %v3510_v36  ;;  %v3433_v36 = vld [vmem:[#allocation5 + $0x2a8] sm:$0xf]  ;;  %v4626_v6 = vld [vmem:[#allocation5 + $0x374] sm:$0xf0] }
  0x77   :  { %1488 = vmatpush.bf16.msra.mxu3 %v3638_v41  ;;  %v4634_v41 = vld [vmem:[#allocation5 + $0x3b4] sm:$0xf0]  ;;  %v3434_v46 = vor.u32 %v4602_v38, %v3433_v36  ;;  %v3530_v14 = vor.u32 %v4626_v6, %v3529_v5  ;;  %v3385_v15 = vld [vmem:[#allocation5 + $0x248] sm:$0xf]  ;;  %v3214_v6 = vor.u32 %v4544_v56, %v3211_v57 }
  0x78   :  { %1501 = vmatpush.bf16.msrb.mxu2 %v3782_v34  ;;  %v4538_v34 = vld [vmem:[#allocation5 + $0xb4] sm:$0xf0]  ;;  %v3562_v49 = vor.u32 %v4634_v41, %v3561_v40  ;;  %v3513_v18 = vld [vmem:[#allocation5 + $0x348] sm:$0xf] }
  0x79   :  { %1461 = vmatpush.bf16.msra.mxu0 %v3366_v52  ;;  %v3178_v43 = vor.u32 %v4538_v34, %v3177_v33  ;;  %v4598_v52 = vld [vmem:[#allocation5 + $0x294] sm:$0xf0]  ;;  %v3257_v21 = vld [vmem:[#allocation5 + $0x148] sm:$0xf] }
  0x7a   :  { %1475 = vmatpush.bf16.msra.mxu1 %v3494_v53  ;;  %v3306_v53 = vor.u32 %v4570_v45, %v3305_v44  ;;  %v3418_v62 = vor.u32 %v4598_v52, %v3417_v51  ;;  %v4562_v10 = vld [vmem:[#allocation5 + $0x174] sm:$0xf0]  ;;  %v3113_v24 = vld [vmem:[#allocation5 + $0x28] sm:$0xf] }
  0x7b   :  { %1489 = vmatpush.bf16.msra.mxu3 %v3622_v59  ;;  %v3289_v59 = vld [vmem:[#allocation5 + $0x188] sm:$0xf]  ;;  %v4558_v22 = vld [vmem:[#allocation5 + $0x154] sm:$0xf0] }
  0x7c   :  { %1502 = vmatpush.bf16.msrb.mxu2 %v3766_v48  ;;  %v4534_v48 = vld [vmem:[#allocation5 + $0x94] sm:$0xf0]  ;;  %v3290_v4 = vor.u32 %v4566_v61, %v3289_v59  ;;  %v3369_v27 = vld [vmem:[#allocation5 + $0x228] sm:$0xf] }
  0x7d   :  { %1462 = vmatpush.bf16.msra.mxu0 %v3350_v7  ;;  %v3162_v58 = vor.u32 %v4534_v48, %v3161_v47  ;;  %v3146_v7 = vor.u32 %v4530_v0, %v3145_v63  ;;  %v4522_v25 = vld [vmem:[#allocation5 + $0x34] sm:$0xf0]  ;;  %v3497_v30 = vld [vmem:[#allocation5 + $0x328] sm:$0xf] }
  0x7e   :  { %1476 = vmatpush.bf16.msra.mxu1 %v3478_v9  ;;  %v3273_v9 = vld [vmem:[#allocation5 + $0x168] sm:$0xf]  ;;  %v4586_v28 = vld [vmem:[#allocation5 + $0x234] sm:$0xf0] }
  0x7f   :  { %1490 = vmatpush.bf16.msra.mxu3 %v3606_v12  ;;  %v3129_v12 = vld [vmem:[#allocation5 + $0x48] sm:$0xf]  ;;  %v3274_v17 = vor.u32 %v4562_v10, %v3273_v9  ;;  %v4618_v31 = vld [vmem:[#allocation5 + $0x334] sm:$0xf0]  ;;  %v3370_v36 = vor.u32 %v4586_v28, %v3369_v27  ;;  %v4540_v9 = vld [vmem:[#allocation5 + $0xcc] sm:$0xf] }
  0x80   :  { %1503 = vmatpush.bf16.msrb.mxu2 %v3750_v3  ;;  %1463 = vmatmul.bf16.vlgmr.msra.gmra.mxu0 %v5138_v54  ;;  %v4594_v3 = vld [vmem:[#allocation5 + $0x274] sm:$0xf0]  ;;  %v3241_v33 = vld [vmem:[#allocation5 + $0x128] sm:$0xf]  ;;  %v3498_v41 = vor.u32 %v4618_v31, %v3497_v30  ;;  %v3195_v10 = vld [vmem:[#allocation5 + $0xd8] sm:$0xf0] }
  0x81   :  { %1553 = vmatpush.bf16.msrb.mxu0 %v3466_v19  ;;  %1477 = vmatmul.bf16.vlgmr.msra.gmra.mxu1 %v5142_v60  ;;  %v3402_v11 = vor.u32 %v4594_v3, %v3401_v2  ;;  %v4622_v19 = vld [vmem:[#allocation5 + $0x354] sm:$0xf0]  ;;  %v3353_v44 = vld [vmem:[#allocation5 + $0x208] sm:$0xf]  ;;  %v4576_v3 = vld [vmem:[#allocation5 + $0x1ec] sm:$0xf] }
  0x82   :  { %1525 = vmatpush.bf16.msrb.mxu1 %v3210_v13  ;;  %1491 = vmatmul.bf16.vlgmr.msra.gmra.mxu3 %v5154_v37  ;;  %v4526_v13 = vld [vmem:[#allocation5 + $0x54] sm:$0xf0]  ;;  %v3849_v61 = vld [vmem:[#allocation5 + $0x5e8] sm:$0xf]  ;;  %v3307_v30 = vld [vmem:[#allocation5 + $0x1b8] sm:$0xf0] }
  0x83   :  { %1518 = vmatpush.bf16.msrb.mxu3 %v3862_v16  ;;  %v4590_v16 = vld [vmem:[#allocation5 + $0x254] sm:$0xf0]  ;;  %v3705_v63 = vld [vmem:[#allocation5 + $0x4c8] sm:$0xf] }
  0x84   :  { %1504 = vmatpush.bf16.msrb.mxu2 %v3734_v20  ;;  %v3130_v20 = vor.u32 %v4526_v13, %v3129_v12  ;;  %v4554_v34 = vld [vmem:[#allocation5 + $0x134] sm:$0xf0]  ;;  %v3833_v13 = vld [vmem:[#allocation5 + $0x5c8] sm:$0xf] }
  0x85   :  { %1554 = vmatpush.bf16.msrb.mxu0 %v3450_v32  ;;  %v3114_v32 = vor.u32 %v4522_v25, %v3113_v24  ;;  %v4518_v38 = vld [vmem:[#allocation5 + $0x14] sm:$0xf0]  ;;  %v3242_v47 = vor.u32 %v4554_v34, %v3241_v33  ;;  %v3817_v25 = vld [vmem:[#allocation5 + $0x5a8] sm:$0xf]  ;;  %v4532_v33 = vld [vmem:[#allocation5 + $0x8c] sm:$0xf] }
  0x86   :  { %1526 = vmatpush.bf16.msrb.mxu1 %v3194_v29  ;;  %v3258_v29 = vor.u32 %v4558_v22, %v3257_v21  ;;  %v4674_v40 = vld [vmem:[#allocation5 + $0x4f4] sm:$0xf0]  ;;  %v4536_v21 = vld [vmem:[#allocation5 + $0xac] sm:$0xf]  ;;  %v3179_v22 = vld [vmem:[#allocation5 + $0xb8] sm:$0xf0] }
  0x87   :  { %1539 = vmatpush.bf16.msra.mxu3 %v3338_v26  ;;  %1505 = vmatmul.bf16.vlgmr.msrb.gmra.mxu2 %v5156_v42  ;;  %v3514_v26 = vor.u32 %v4622_v19, %v3513_v18  ;;  %v4582_v45 = vld [vmem:[#allocation5 + $0x214] sm:$0xf0]  ;;  %v3323_v18 = vld [vmem:[#allocation5 + $0x1d8] sm:$0xf0]  ;;  %v3198_v19 = vor.u32 %v4540_v9, %v3195_v10  ;;  %v3673_v27 = vld [vmem:[#allocation5 + $0x488] sm:$0xf]  ;;  %v3182_v31 = vor.u32 %v4536_v21, %v3179_v22 }
  0x88   :  { %1567 = vmatpush.bf16.msra.mxu2 %v3594_v23  ;;  %v3386_v23 = vor.u32 %v4590_v16, %v3385_v15  ;;  %v4614_v48 = vld [vmem:[#allocation5 + $0x314] sm:$0xf0]  ;;  %v3354_v59 = vor.u32 %v4582_v45, %v3353_v44  ;;  %v3689_v15 = vld [vmem:[#allocation5 + $0x4a8] sm:$0xf]  ;;  %v3163_v34 = vld [vmem:[#allocation5 + $0x98] sm:$0xf0] }
  0x89   :  { %1555 = vmatpush.bf16.msrb.mxu0 %v3434_v46  ;;  %v3481_v46 = vld [vmem:[#allocation5 + $0x308] sm:$0xf]  ;;  %v4710_v51 = vld [vmem:[#allocation5 + $0x614] sm:$0xf0]  ;;  %v3291_v44 = vld [vmem:[#allocation5 + $0x198] sm:$0xf0]  ;;  %v3166_v45 = vor.u32 %v4532_v33, %v3163_v34 }
  0x8a   :  { %1527 = vmatpush.bf16.msrb.mxu1 %v3178_v43  ;;  %v3225_v43 = vld [vmem:[#allocation5 + $0x108] sm:$0xf]  ;;  %v3482_v0 = vor.u32 %v4614_v48, %v3481_v46  ;;  %v4666_v16 = vld [vmem:[#allocation5 + $0x4b4] sm:$0xf0]  ;;  %v3147_v48 = vld [vmem:[#allocation5 + $0x78] sm:$0xf0] }
  0x8b   :  { %1540 = vmatpush.bf16.msra.mxu3 %v3322_v39  ;;  %v3721_v39 = vld [vmem:[#allocation5 + $0x4e8] sm:$0xf]  ;;  %v4662_v28 = vld [vmem:[#allocation5 + $0x494] sm:$0xf0]  ;;  %v3259_v9 = vld [vmem:[#allocation5 + $0x158] sm:$0xf0] }
  0x8c   :  { %1568 = vmatpush.bf16.msra.mxu2 %v3578_v35  ;;  %v3097_v35 = vld [vmem:[#allocation5 + $0x8] sm:$0xf]  ;;  %v4654_v57 = vld [vmem:[#allocation5 + $0x454] sm:$0xf0]  ;;  %v3243_v21 = vld [vmem:[#allocation5 + $0x138] sm:$0xf0] }
  0x8d   :  { %1556 = vmatpush.bf16.msrb.mxu0 %v3418_v62  ;;  %v3098_v52 = vor.u32 %v4518_v38, %v3097_v35  ;;  %v4706_v62 = vld [vmem:[#allocation5 + $0x5f4] sm:$0xf0]  ;;  %v3674_v35 = vor.u32 %v4662_v28, %v3673_v27  ;;  %v3801_v38 = vld [vmem:[#allocation5 + $0x588] sm:$0xf]  ;;  %v4516_v27 = vld [vmem:[#allocation5 + $0xc] sm:$0xf] }
  0x8e   :  { %1528 = vmatpush.bf16.msrb.mxu1 %v3162_v58  ;;  %v3722_v58 = vor.u32 %v4674_v40, %v3721_v39  ;;  %v4694_v39 = vld [vmem:[#allocation5 + $0x594] sm:$0xf0]  ;;  %v3657_v40 = vld [vmem:[#allocation5 + $0x468] sm:$0xf]  ;;  %v3099_v28 = vld [vmem:[#allocation5 + $0x18] sm:$0xf0] }
  0x8f   :  { %1541 = vmatpush.bf16.msra.mxu3 %v3306_v53  ;;  %v4550_v53 = vld [vmem:[#allocation5 + $0x114] sm:$0xf0]  ;;  %v3802_v46 = vor.u32 %v4694_v39, %v3801_v38  ;;  %v3641_v56 = vld [vmem:[#allocation5 + $0x448] sm:$0xf]  ;;  %v3595_v33 = vld [vmem:[#allocation5 + $0x3f8] sm:$0xf0]  ;;  %v3102_v39 = vor.u32 %v4516_v27, %v3099_v28 }
  0x90   :  { %1569 = vmatpush.bf16.msra.mxu2 %v3562_v49  ;;  %v3865_v49 = vld [vmem:[#allocation5 + $0x608] sm:$0xf]  ;;  %v3226_v5 = vor.u32 %v4550_v53, %v3225_v43  ;;  %v4564_v43 = vld [vmem:[#allocation5 + $0x18c] sm:$0xf]  ;;  %v4690_v53 = vld [vmem:[#allocation5 + $0x574] sm:$0xf0] }
  0x91   :  { %1557 = vmatpush.bf16.msrb.mxu0 %v3402_v11  ;;  %v3866_v2 = vor.u32 %v4710_v51, %v3865_v49  ;;  %v3294_v51 = vor.u32 %v4564_v43, %v3291_v44  ;;  %v4604_v38 = vld [vmem:[#allocation5 + $0x2cc] sm:$0xf]  ;;  %v3227_v43 = vld [vmem:[#allocation5 + $0x118] sm:$0xf0] }
  0x92   :  { %1529 = vmatpush.bf16.msrb.mxu1 %v3146_v7  ;;  %3872 = vmatmul.msk.bf16.vlgmr.msrb.gmra.mxu3 %vm1325_vm0, %v5150_v50  ;;  %v3850_v7 = vor.u32 %v4706_v62, %v3849_v61  ;;  %v3531_v28 = vld [vmem:[#allocation5 + $0x378] sm:$0xf0] }
  0x93   :  { %1542 = vmatpush.bf16.msra.mxu3 %v3290_v4  ;;  %v3339_v4 = vld [vmem:[#allocation5 + $0x1f8] sm:$0xf0] }
  0x94   :  { %1570 = vmatpush.bf16.msra.mxu2 %v3546_v1  ;;  %v4670_v1 = vld [vmem:[#allocation5 + $0x4d4] sm:$0xf0]  ;;  %v3342_v12 = vor.u32 %v4576_v3, %v3339_v4  ;;  %v3769_v3 = vld [vmem:[#allocation5 + $0x548] sm:$0xf] }
  0x95   :  { %1558 = vmatpush.bf16.msrb.mxu0 %v3386_v23  ;;  %v3706_v11 = vor.u32 %v4670_v1, %v3705_v63  ;;  %v3690_v23 = vor.u32 %v4666_v16, %v3689_v15  ;;  %v4524_v63 = vld [vmem:[#allocation5 + $0x4c] sm:$0xf]  ;;  %v3642_v1 = vor.u32 %v4654_v57, %v3641_v56  ;;  %v4686_v4 = vld [vmem:[#allocation5 + $0x554] sm:$0xf0]  ;;  %v3753_v16 = vld [vmem:[#allocation5 + $0x528] sm:$0xf] }
  0x96   :  { %1530 = vmatpush.bf16.msrb.mxu1 %v3130_v20  ;;  %v4668_v56 = vld [vmem:[#allocation5 + $0x4cc] sm:$0xf]  ;;  %v3707_v57 = vld [vmem:[#allocation5 + $0x4d8] sm:$0xf0] }
  0x97   :  { %1543 = vmatpush.bf16.msra.mxu3 %v3274_v17  ;;  %v4572_v17 = vld [vmem:[#allocation5 + $0x1cc] sm:$0xf] }
  0x98   :  { %1571 = vmatpush.bf16.msra.mxu2 %v3530_v14  ;;  %v4702_v14 = vld [vmem:[#allocation5 + $0x5d4] sm:$0xf0]  ;;  %v3326_v24 = vor.u32 %v4572_v17, %v3323_v18  ;;  %v3609_v18 = vld [vmem:[#allocation5 + $0x408] sm:$0xf] }
  0x99   :  { %1559 = vmatpush.bf16.msrb.mxu0 %v3370_v36  ;;  %v3834_v20 = vor.u32 %v4702_v14, %v3833_v13  ;;  %v3115_v13 = vld [vmem:[#allocation5 + $0x38] sm:$0xf0]  ;;  %v4682_v17 = vld [vmem:[#allocation5 + $0x534] sm:$0xf0] }
  0x9a   :  { %1531 = vmatpush.bf16.msrb.mxu1 %v3114_v32 }
  0x9b   :  { %1544 = vmatpush.bf16.msra.mxu3 %v3258_v29  ;;  %v4568_v29 = vld [vmem:[#allocation5 + $0x1ac] sm:$0xf] }
  0x9c   :  { %1572 = vmatpush.bf16.msra.mxu2 %v3514_v26  ;;  %v4698_v26 = vld [vmem:[#allocation5 + $0x5b4] sm:$0xf0]  ;;  %v3310_v36 = vor.u32 %v4568_v29, %v3307_v30 }
  0x9d   :  { %1560 = vmatpush.bf16.msrb.mxu0 %v3354_v59  ;;  %v3818_v32 = vor.u32 %v4698_v26, %v3817_v25  ;;  %v3275_v59 = vld [vmem:[#allocation5 + $0x178] sm:$0xf0]  ;;  %v3754_v25 = vor.u32 %v4682_v17, %v3753_v16  ;;  %v3737_v26 = vld [vmem:[#allocation5 + $0x508] sm:$0xf] }
  0x9e   :  { %1532 = vmatpush.bf16.msrb.mxu1 %v3098_v52  ;;  %v3785_v52 = vld [vmem:[#allocation5 + $0x568] sm:$0xf]  ;;  %v3547_v17 = vld [vmem:[#allocation5 + $0x398] sm:$0xf0] }
  0x9f   :  { %1545 = vmatpush.bf16.msra.mxu3 %v3242_v47  ;;  %v4528_v47 = vld [vmem:[#allocation5 + $0x6c] sm:$0xf]  ;;  %v3786_v62 = vor.u32 %v4690_v53, %v3785_v52  ;;  %v3579_v53 = vld [vmem:[#allocation5 + $0x3d8] sm:$0xf0] }
  0xa0   :  { %1573 = vmatpush.bf16.msra.mxu2 %v3498_v41  ;;  %1561 = vmatmul.bf16.vlgmr.msrb.gmra.mxu0 %v5138_v54  ;;  %v4658_v41 = vld [vmem:[#allocation5 + $0x474] sm:$0xf0]  ;;  %v3150_v61 = vor.u32 %v4528_v47, %v3147_v48 }
  0xa1   :  { %1616 = vmatpush.bf16.msra.mxu0 %v3866_v2  ;;  %1533 = vmatmul.bf16.vlgmr.msrb.gmra.mxu1 %v5140_v55  ;;  %v3658_v49 = vor.u32 %v4658_v41, %v3657_v40  ;;  %v3451_v40 = vld [vmem:[#allocation5 + $0x2d8] sm:$0xf0]  ;;  %v4548_v41 = vld [vmem:[#allocation5 + $0x10c] sm:$0xf] }
  0xa2   :  { %1581 = vmatpush.bf16.msra.mxu1 %v3722_v58  ;;  %v4560_v58 = vld [vmem:[#allocation5 + $0x16c] sm:$0xf]  ;;  %v3230_v52 = vor.u32 %v4548_v41, %v3227_v43  ;;  %v3643_v43 = vld [vmem:[#allocation5 + $0x458] sm:$0xf0] }
  0xa3   :  { %1546 = vmatpush.bf16.msra.mxu3 %v3226_v5  ;;  %v3278_v2 = vor.u32 %v4560_v58, %v3275_v59  ;;  %v3625_v5 = vld [vmem:[#allocation5 + $0x428] sm:$0xf]  ;;  %v4600_v59 = vld [vmem:[#allocation5 + $0x2ac] sm:$0xf] }
  0xa4   :  { %1574 = vmatpush.bf16.msra.mxu2 %v3482_v0  ;;  %v3131_v0 = vld [vmem:[#allocation5 + $0x58] sm:$0xf0]  ;;  %v4652_v41 = vld [vmem:[#allocation5 + $0x44c] sm:$0xf] }
  0xa5   :  { %1637 = vmatpush.bf16.msrb.mxu0 %v3342_v12  ;;  %v3134_v10 = vor.u32 %v4524_v63, %v3131_v0  ;;  %v4520_v12 = vld [vmem:[#allocation5 + $0x2c] sm:$0xf]  ;;  %v3835_v63 = vld [vmem:[#allocation5 + $0x5d8] sm:$0xf0] }
  0xa6   :  { %1582 = vmatpush.bf16.msra.mxu1 %v3706_v11  ;;  %1547 = vmatmul.bf16.vlgmr.msra.gmra.mxu3 %v5146_v8  ;;  %v3770_v11 = vor.u32 %v4686_v4, %v3769_v3  ;;  %v3118_v22 = vor.u32 %v4520_v12, %v3115_v13  ;;  %v3563_v4 = vld [vmem:[#allocation5 + $0x3b8] sm:$0xf0] }
  0xa7   :  { %1595 = vmatpush.bf16.msrb.mxu3 %v3850_v7  ;;  %1575 = vmatmul.bf16.vlgmr.msra.gmra.mxu2 %v5142_v60  ;;  %v4556_v7 = vld [vmem:[#allocation5 + $0x14c] sm:$0xf]  ;;  %v3819_v12 = vld [vmem:[#allocation5 + $0x5b8] sm:$0xf0] }
  0xa8   :  { %1623 = vmatpush.bf16.msrb.mxu2 %v3214_v6  ;;  %v4650_v6 = vld [vmem:[#allocation5 + $0x434] sm:$0xf0]  ;;  %v3262_v15 = vor.u32 %v4556_v7, %v3259_v9  ;;  %v4596_v9 = vld [vmem:[#allocation5 + $0x28c] sm:$0xf] }
  0xa9   :  { %1638 = vmatpush.bf16.msrb.mxu0 %v3326_v24  ;;  %v3626_v14 = vor.u32 %v4650_v6, %v3625_v5  ;;  %v3467_v24 = vld [vmem:[#allocation5 + $0x2f8] sm:$0xf0]  ;;  %v4664_v5 = vld [vmem:[#allocation5 + $0x4ac] sm:$0xf] }
  0xaa   :  { %1583 = vmatpush.bf16.msra.mxu1 %v3690_v23  ;;  %v4608_v23 = vld [vmem:[#allocation5 + $0x2ec] sm:$0xf]  ;;  %v3691_v6 = vld [vmem:[#allocation5 + $0x4b8] sm:$0xf0] }
  0xab   :  { %1596 = vmatpush.bf16.msrb.mxu3 %v3834_v20  ;;  %v4552_v20 = vld [vmem:[#allocation5 + $0x12c] sm:$0xf]  ;;  %v3470_v34 = vor.u32 %v4608_v23, %v3467_v24 }
  0xac   :  { %1624 = vmatpush.bf16.msrb.mxu2 %v3198_v19  ;;  %v4646_v19 = vld [vmem:[#allocation5 + $0x414] sm:$0xf0]  ;;  %v3246_v30 = vor.u32 %v4552_v20, %v3243_v21  ;;  %v4592_v21 = vld [vmem:[#allocation5 + $0x26c] sm:$0xf] }
  0xad   :  { %1639 = vmatpush.bf16.msrb.mxu0 %v3310_v36  ;;  %v3610_v29 = vor.u32 %v4646_v19, %v3609_v18  ;;  %v3723_v36 = vld [vmem:[#allocation5 + $0x4f8] sm:$0xf0]  ;;  %v4660_v18 = vld [vmem:[#allocation5 + $0x48c] sm:$0xf] }
  0xae   :  { %1584 = vmatpush.bf16.msra.mxu1 %v3674_v35  ;;  %v4672_v35 = vld [vmem:[#allocation5 + $0x4ec] sm:$0xf]  ;;  %v3675_v19 = vld [vmem:[#allocation5 + $0x498] sm:$0xf0] }
  0xaf   :  { %1597 = vmatpush.bf16.msrb.mxu3 %v3818_v32  ;;  %v4640_v32 = vld [vmem:[#allocation5 + $0x3ec] sm:$0xf]  ;;  %v3726_v48 = vor.u32 %v4672_v35, %v3723_v36 }
  0xb0   :  { %1625 = vmatpush.bf16.msrb.mxu2 %v3182_v31  ;;  %3873 = vmatmul.msk.bf16.vlgmr.msra.gmra.mxu0 %vm1325_vm0, %v5150_v50  ;;  %v4678_v31 = vld [vmem:[#allocation5 + $0x514] sm:$0xf0]  ;;  %v3598_v47 = vor.u32 %v4640_v32, %v3595_v33  ;;  %v4692_v23 = vld [vmem:[#allocation5 + $0x58c] sm:$0xf] }
  0xb1   :  { %1640 = vmatpush.bf16.msrb.mxu0 %v3294_v51  ;;  %v3738_v44 = vor.u32 %v4678_v31, %v3737_v26  ;;  %v3454_v51 = vor.u32 %v4604_v38, %v3451_v40  ;;  %v4624_v26 = vld [vmem:[#allocation5 + $0x36c] sm:$0xf]  ;;  %v3515_v40 = vld [vmem:[#allocation5 + $0x358] sm:$0xf0] }
  0xb2   :  { %1585 = vmatpush.bf16.msra.mxu1 %v3658_v49  ;;  %v4636_v49 = vld [vmem:[#allocation5 + $0x3cc] sm:$0xf]  ;;  %v3534_v35 = vor.u32 %v4624_v26, %v3531_v28  ;;  %v4737_v28 = vld [vmem:[#allocation8 + $0xcc] sm:$0xf0] }
  0xb3   :  { %1598 = vmatpush.bf16.msrb.mxu3 %v3802_v46  ;;  %v3851_v46 = vld [vmem:[#allocation5 + $0x5f8] sm:$0xf0]  ;;  %v3582_v0 = vor.u32 %v4636_v49, %v3579_v53  ;;  %v4588_v32 = vld [vmem:[#allocation5 + $0x24c] sm:$0xf] }
  0xb4   :  { %1626 = vmatpush.bf16.msrb.mxu2 %v3166_v45  ;;  %v4704_v45 = vld [vmem:[#allocation5 + $0x5ec] sm:$0xf] }
  0xb5   :  { %1641 = vmatpush.bf16.msrb.mxu0 %v3278_v2  ;;  %v3854_v58 = vor.u32 %v4704_v45, %v3851_v46  ;;  %v4632_v2 = vld [vmem:[#allocation5 + $0x3ac] sm:$0xf]  ;;  %v3371_v46 = vld [vmem:[#allocation5 + $0x238] sm:$0xf0] }
  0xb6   :  { %1586 = vmatpush.bf16.msra.mxu1 %v3642_v1  ;;  %v3710_v1 = vor.u32 %v4668_v56, %v3707_v57  ;;  %v3566_v13 = vor.u32 %v4632_v2, %v3563_v4  ;;  %v4688_v33 = vld [vmem:[#allocation5 + $0x56c] sm:$0xf]  ;;  %v3499_v57 = vld [vmem:[#allocation5 + $0x338] sm:$0xf0] }
  0xb7   :  { %1599 = vmatpush.bf16.msrb.mxu3 %v3786_v62  ;;  %v4700_v62 = vld [vmem:[#allocation5 + $0x5cc] sm:$0xf]  ;;  %v3755_v2 = vld [vmem:[#allocation5 + $0x538] sm:$0xf0] }
  0xb8   :  { %1627 = vmatpush.bf16.msrb.mxu2 %v3150_v61  ;;  %v3435_v61 = vld [vmem:[#allocation5 + $0x2b8] sm:$0xf0]  ;;  %v3838_v7 = vor.u32 %v4700_v62, %v3835_v63  ;;  %v4620_v38 = vld [vmem:[#allocation5 + $0x34c] sm:$0xf] }
  0xb9   :  { %1642 = vmatpush.bf16.msrb.mxu0 %v3262_v15  ;;  %v3438_v3 = vor.u32 %v4600_v59, %v3435_v61  ;;  %v4628_v15 = vld [vmem:[#allocation5 + $0x38c] sm:$0xf]  ;;  %v3518_v49 = vor.u32 %v4620_v38, %v3515_v40  ;;  %v3627_v59 = vld [vmem:[#allocation5 + $0x438] sm:$0xf0]  ;;  %v3957_v38 = vld [vmem:[#allocation8 + $0xa0] sm:$0xf] }
  0xba   :  { %1587 = vmatpush.bf16.msra.mxu1 %v3626_v14  ;;  %v3694_v14 = vor.u32 %v4664_v5, %v3691_v6  ;;  %v3550_v24 = vor.u32 %v4628_v15, %v3547_v17  ;;  %v4584_v45 = vld [vmem:[#allocation5 + $0x22c] sm:$0xf]  ;;  %v3867_v4 = vld [vmem:[#allocation5 + $0x618] sm:$0xf0]  ;;  %v4741_v17 = vld [vmem:[#allocation8 + $0xec] sm:$0xf0] }
  0xbb   :  { %1600 = vmatpush.bf16.msrb.mxu3 %v3770_v11  ;;  %v4696_v11 = vld [vmem:[#allocation5 + $0x5ac] sm:$0xf]  ;;  %v3374_v56 = vor.u32 %v4584_v45, %v3371_v46 }
  0xbc   :  { %1628 = vmatpush.bf16.msrb.mxu2 %v3134_v10  ;;  %v3419_v10 = vld [vmem:[#allocation5 + $0x298] sm:$0xf0]  ;;  %v3822_v20 = vor.u32 %v4696_v11, %v3819_v12  ;;  %v4580_v63 = vld [vmem:[#allocation5 + $0x20c] sm:$0xf] }
  0xbd   :  { %1643 = vmatpush.bf16.msrb.mxu0 %v3246_v30  ;;  %v3422_v16 = vor.u32 %v4596_v9, %v3419_v10  ;;  %v3659_v30 = vld [vmem:[#allocation5 + $0x478] sm:$0xf0]  ;;  %v5180_v9 = vld [vmem:[#allocation7] sm:$0xf] }
  0xbe   :  { %1588 = vmatpush.bf16.msra.mxu1 %v3610_v29  ;;  %v4656_v29 = vld [vmem:[#allocation5 + $0x46c] sm:$0xf]  ;;  %v3483_v12 = vld [vmem:[#allocation5 + $0x318] sm:$0xf0] }
  0xbf   :  { %1601 = vmatpush.bf16.msrb.mxu3 %v3754_v25  ;;  %v3678_v25 = vor.u32 %v4660_v18, %v3675_v19  ;;  %v3662_v36 = vor.u32 %v4656_v29, %v3659_v30  ;;  %v4676_v18 = vld [vmem:[#allocation5 + $0x50c] sm:$0xf] }
  0xc0   :  { %1629 = vmatpush.bf16.msrb.mxu2 %v3118_v22  ;;  %v3403_v22 = vld [vmem:[#allocation5 + $0x278] sm:$0xf0]  ;;  %v1338_v53 = vpop.f32.mrf.mxu0 }
  0xc1   :  { %1589 = vmatmul.bf16.vlgmr.msra.gmra.mxu1 %v5154_v37  ;;  %1644 = vmatpush.bf16.msrb.mxu0 %v3230_v52  ;;  %v3406_v27 = vor.u32 %v4592_v21, %v3403_v22  ;;  %v4616_v52 = vld [vmem:[#allocation5 + $0x32c] sm:$0xf]  ;;  %v4117_v21 = vld [vmem:[#allocation8 + $0x1e0] sm:$0xf]  ;;  %v4773_v22 = vld [vmem:[#allocation8 + $0x1ec] sm:$0xf0] }
  0xc2   :  { %1651 = vmatpush.bf16.msrb.mxu1 %v3470_v34  ;;  %v3787_v34 = vld [vmem:[#allocation5 + $0x578] sm:$0xf0]  ;;  %v3502_v5 = vor.u32 %v4616_v52, %v3499_v57  ;;  %v4118_v29 = vor.u32 %v4773_v22, %v4117_v21  ;;  %v4069_v52 = vld [vmem:[#allocation8 + $0x180] sm:$0xf]  ;;  %v4749_v21 = vld [vmem:[#allocation8 + $0x12c] sm:$0xf0] }
  0xc3   :  { %1602 = vmatpush.bf16.msrb.mxu3 %v3738_v44  ;;  %v3790_v44 = vor.u32 %v4688_v33, %v3787_v34 }
  0xc4   :  { %1630 = vmatpush.bf16.msrb.mxu2 %v3102_v39  ;;  %1645 = vmatmul.bf16.vlgmr.msrb.gmra.mxu0 %v5146_v8  ;;  %v3387_v8 = vld [vmem:[#allocation5 + $0x258] sm:$0xf0]  ;;  %v5178_v61 = vpop.f32.mrf.mxu1 }
  0xc5   :  { %1693 = vmatpush.bf16.msra.mxu0 %v3854_v58  ;;  %v3390_v39 = vor.u32 %v4588_v32, %v3387_v8  ;;  %v4648_v58 = vld [vmem:[#allocation5 + $0x42c] sm:$0xf]  ;;  %v5182_v10 = vpop.f32.mrf.mxu2  ;;  %v4769_v32 = vld [vmem:[#allocation8 + $0x1cc] sm:$0xf0] }
  0xc6   :  { %1652 = vmatpush.bf16.msrb.mxu1 %v3454_v51  ;;  %1603 = vmatmul.bf16.vlgmr.msrb.gmra.mxu3 %v5156_v42  ;;  %v3646_v51 = vor.u32 %v4652_v41, %v3643_v43  ;;  %v3630_v6 = vor.u32 %v4648_v58, %v3627_v59  ;;  %v4085_v43 = vld [vmem:[#allocation8 + $0x1a0] sm:$0xf]  ;;  %v4725_v59 = vld [vmem:[#allocation8 + $0x6c] sm:$0xf0] }
  0xc7   :  { %1665 = vmatpush.bf16.msra.mxu3 %v3598_v47  ;;  %1631 = vmatmul.bf16.vlgmr.msrb.gmra.mxu2 %v5140_v55  ;;  %v3803_v55 = vld [vmem:[#allocation5 + $0x598] sm:$0xf0]  ;;  %v4684_v47 = vld [vmem:[#allocation5 + $0x54c] sm:$0xf]  ;;  %v1380_v33 = vpop.f32.mrf.mxu3  ;;  %v3925_v58 = vld [vmem:[#allocation8 + $0x60] sm:$0xf] }
  0xc8   :  { %1679 = vmatpush.bf16.msra.mxu2 %v3726_v48  ;;  %v3806_v31 = vor.u32 %v4692_v23, %v3803_v55  ;;  %v3771_v48 = vld [vmem:[#allocation5 + $0x558] sm:$0xf0]  ;;  %v1340_v30 = vpop.f32.mrf.mxu0 }
  0xc9   :  { %1694 = vmatpush.bf16.msra.mxu0 %v3838_v7  ;;  %v3774_v62 = vor.u32 %v4684_v47, %v3771_v48  ;;  %v4612_v7 = vld [vmem:[#allocation5 + $0x30c] sm:$0xf]  ;;  %v3941_v47 = vld [vmem:[#allocation8 + $0x80] sm:$0xf]  ;;  %v4729_v48 = vld [vmem:[#allocation8 + $0x8c] sm:$0xf0] }
  0xca   :  { %1653 = vmatpush.bf16.msrb.mxu1 %v3438_v3  ;;  %v4708_v3 = vld [vmem:[#allocation5 + $0x60c] sm:$0xf]  ;;  %v3486_v23 = vor.u32 %v4612_v7, %v3483_v12 }
  0xcb   :  { %1666 = vmatpush.bf16.msra.mxu3 %v3582_v0  ;;  %v3355_v0 = vld [vmem:[#allocation5 + $0x218] sm:$0xf0]  ;;  %v3870_v19 = vor.u32 %v4708_v3, %v3867_v4  ;;  %v3909_v4 = vld [vmem:[#allocation8 + $0x40] sm:$0xf] }
  0xcc   :  { %1680 = vmatpush.bf16.msra.mxu2 %v3710_v1  ;;  %v4680_v1 = vld [vmem:[#allocation5 + $0x52c] sm:$0xf]  ;;  %v3358_v11 = vor.u32 %v4580_v63, %v3355_v0  ;;  %v1354_v8 = vpop.f32.mrf.mxu1  ;;  %v4053_v63 = vld [vmem:[#allocation8 + $0x160] sm:$0xf]  ;;  %v4757_v0 = vld [vmem:[#allocation8 + $0x16c] sm:$0xf0] }
  0xcd   :  { %1695 = vmatpush.bf16.msra.mxu0 %v3822_v20  ;;  %v3758_v15 = vor.u32 %v4680_v1, %v3755_v2  ;;  %v3739_v20 = vld [vmem:[#allocation5 + $0x518] sm:$0xf0]  ;;  %v1368_v41 = vpop.f32.mrf.mxu2  ;;  %v3926_v1 = vor.u32 %v4725_v59, %v3925_v58  ;;  %v4801_v58 = vld [vmem:[#allocation8 + $0x2cc] sm:$0xf0]  ;;  %v4727_v59 = vld [vmem:[#allocation8 + $0x84] sm:$0xf] }
  0xce   :  { %1654 = vmatpush.bf16.msrb.mxu1 %v3422_v16  ;;  %v3989_v16 = vld [vmem:[#allocation8 + $0xe0] sm:$0xf]  ;;  %v3742_v26 = vor.u32 %v4676_v18, %v3739_v20  ;;  %v4717_v18 = vld [vmem:[#allocation8 + $0x2c] sm:$0xf0] }
  0xcf   :  { %1667 = vmatpush.bf16.msra.mxu3 %v3566_v13  ;;  %v4644_v13 = vld [vmem:[#allocation5 + $0x40c] sm:$0xf]  ;;  %v4021_v20 = vld [vmem:[#allocation8 + $0x120] sm:$0xf] }
  0xd0   :  { %1681 = vmatpush.bf16.msra.mxu2 %v3694_v14  ;;  %v3611_v14 = vld [vmem:[#allocation5 + $0x418] sm:$0xf0] }
  0xd1   :  { %1696 = vmatpush.bf16.msra.mxu0 %v3806_v31  ;;  %v3614_v55 = vor.u32 %v4644_v13, %v3611_v14  ;;  %v4101_v31 = vld [vmem:[#allocation8 + $0x1c0] sm:$0xf] }
  0xd2   :  { %1655 = vmatpush.bf16.msrb.mxu1 %v3406_v27  ;;  %v3973_v27 = vld [vmem:[#allocation8 + $0xc0] sm:$0xf]  ;;  %v4102_v40 = vor.u32 %v4769_v32, %v4101_v31  ;;  %v4771_v32 = vld [vmem:[#allocation8 + $0x1e4] sm:$0xf] }
  0xd3   :  { %1668 = vmatpush.bf16.msra.mxu3 %v3550_v24  ;;  %v3990_v24 = vor.u32 %v4741_v17, %v3989_v16  ;;  %v3974_v34 = vor.u32 %v4737_v28, %v3973_v27  ;;  %v3893_v17 = vld [vmem:[#allocation8 + $0x20] sm:$0xf]  ;;  %v4739_v27 = vld [vmem:[#allocation8 + $0xe4] sm:$0xf]  ;;  %v3991_v28 = vld [vmem:[#allocation8 + $0xf0] sm:$0xf0] }
  0xd4   :  { %1682 = vmatpush.bf16.msra.mxu2 %v3678_v25  ;;  %v337_v25 = vperm.slane %v5180_v9, 0 }
  0xd5   :  { %1697 = vmatpush.bf16.msra.mxu0 %v3790_v44  ;;  %v4765_v44 = vld [vmem:[#allocation8 + $0x1ac] sm:$0xf0] }
  0xd6   :  { %1656 = vmatpush.bf16.msrb.mxu1 %v3390_v39  ;;  %v4733_v39 = vld [vmem:[#allocation8 + $0xac] sm:$0xf0] }
  0xd7   :  { %1669 = vmatpush.bf16.msra.mxu3 %v3534_v35  ;;  %v1339_v35 = vadd.f32 %v1338_v53, %v337_v25  ;;  %v4761_v53 = vld [vmem:[#allocation8 + $0x18c] sm:$0xf0] }
  0xd8   :  { %1683 = vmatpush.bf16.msra.mxu2 %v3662_v36  ;;  %v1341_v36 = vadd.f32 %v1340_v30, %v337_v25  ;;  %v3877_v25 = vld [vmem:[#allocation8] sm:$0xf]  ;;  %v4745_v30 = vld [vmem:[#allocation8 + $0x10c] sm:$0xf0] }
  0xd9   :  { %1698 = vmatpush.bf16.msra.mxu0 %v3774_v62  ;;  %v1353_v45 = vadd.f32 %v5178_v61, %v1339_v35  ;;  %v1382_v62 = vpop.f32.mrf.mxu3  ;;  %v1422_v61 = vpop.f32.mrf.mxu2 }
  0xda   :  { %1657 = vmatpush.bf16.msrb.mxu1 %v3374_v56  ;;  %v1355_v46 = vadd.f32 %v1354_v8, %v1341_v36  ;;  %v4119_v8 = vld [vmem:[#allocation8 + $0x1f0] sm:$0xf0]  ;;  %v3994_v36 = vor.u32 %v4739_v27, %v3991_v28  ;;  %v4181_v27 = vld [vmem:[#allocation8 + $0x260] sm:$0xf]  ;;  %v4715_v28 = vld [vmem:[#allocation8 + $0x24] sm:$0xf] }
  0xdb   :  { %1670 = vmatpush.bf16.msra.mxu3 %v3518_v49  ;;  %v4086_v49 = vor.u32 %v4765_v44, %v4085_v43  ;;  %v1367_v57 = vadd.f32 %v5182_v10, %v1353_v45  ;;  %v4753_v10 = vld [vmem:[#allocation8 + $0x14c] sm:$0xf0]  ;;  %v4767_v44 = vld [vmem:[#allocation8 + $0x1c4] sm:$0xf] }
  0xdc   :  { %1684 = vmatpush.bf16.msra.mxu2 %v3646_v51 }
  0xdd   :  { %1699 = vmatpush.bf16.msra.mxu0 %v3758_v15  ;;  %v1394_v51 = vpop.f32.mrf.mxu0  ;;  %v1381_v2 = vadd.f32 %v1380_v33, %v1367_v57 }
  0xde   :  { %1658 = vmatpush.bf16.msrb.mxu1 %v3358_v11  ;;  %v1408_v56 = vpop.f32.mrf.mxu1  ;;  %v4037_v11 = vld [vmem:[#allocation8 + $0x140] sm:$0xf] }
  0xdf   :  { %1671 = vmatpush.bf16.msra.mxu3 %v3502_v5  ;;  %v4721_v5 = vld [vmem:[#allocation8 + $0x4c] sm:$0xf0]  ;;  %v1395_v12 = vadd.f32 %v1394_v51, %v1381_v2  ;;  %v3959_v51 = vld [vmem:[#allocation8 + $0xb0] sm:$0xf0] }
  0xe0   :  { %1685 = vmatpush.bf16.msra.mxu2 %v3630_v6  ;;  %v4054_v6 = vor.u32 %v4757_v0, %v4053_v63  ;;  %v3910_v15 = vor.u32 %v4721_v5, %v3909_v4  ;;  %v4071_v2 = vld [vmem:[#allocation8 + $0x190] sm:$0xf0]  ;;  %v4213_v4 = vld [vmem:[#allocation8 + $0x2a0] sm:$0xf]  ;;  %v4797_v5 = vld [vmem:[#allocation8 + $0x2ac] sm:$0xf0] }
  0xe1   :  { %1659 = vmatmul.bf16.vlgmr.msrb.gmra.mxu1 %v5138_v54  ;;  %1700 = vmatpush.bf16.msra.mxu0 %v3742_v26  ;;  %v3958_v54 = vor.u32 %v4733_v39, %v3957_v38  ;;  %v1409_v22 = vadd.f32 %v1408_v56, %v1395_v12  ;;  %v4713_v26 = vld [vmem:[#allocation8 + $0xc] sm:$0xf0]  ;;  %v4735_v39 = vld [vmem:[#allocation8 + $0xc4] sm:$0xf] }
  0xe2   :  { %1714 = vmatpush.bf16.msra.mxu1 %v3870_v19  ;;  %v4038_v19 = vor.u32 %v4753_v10, %v4037_v11  ;;  %v3878_v33 = vor.u32 %v4713_v26, %v3877_v25  ;;  %v4763_v56 = vld [vmem:[#allocation8 + $0x1a4] sm:$0xf]  ;;  %v4214_v10 = vor.u32 %v4797_v5, %v4213_v4 }
  0xe3   :  { %1672 = vmatpush.bf16.msra.mxu3 %v3486_v23  ;;  %v1424_v23 = vpop.f32.mrf.mxu2  ;;  %v1423_v31 = vadd.f32 %v1422_v61, %v1409_v22  ;;  %v4755_v12 = vld [vmem:[#allocation8 + $0x164] sm:$0xf] }
  0xe4   :  { %1686 = vmatpush.bf16.msra.mxu2 %v3614_v55  ;;  %1701 = vmatmul.bf16.vlgmr.msra.gmra.mxu0 %v5156_v42  ;;  %v4070_v42 = vor.u32 %v4761_v53, %v4069_v52  ;;  %v3894_v55 = vor.u32 %v4717_v18, %v3893_v17  ;;  %v3911_v17 = vld [vmem:[#allocation8 + $0x50] sm:$0xf0]  ;;  %v4751_v22 = vld [vmem:[#allocation8 + $0x144] sm:$0xf] }
  0xe5   :  { %v1396_v7 = vpop.f32.mrf.mxu0  ;;  %v5193_v35 = vpop.f32.mrf.mxu3  ;;  %v1721_v43 = vmax.f32 %v1423_v31, 0.0 }
  0xe6   :  { %2525 = vmatpush.bf16.msrb.mxu1 %v4118_v29  ;;  %1673 = vmatmul.bf16.vlgmr.msra.gmra.mxu3 %v5142_v60  ;;  %v3942_v60 = vor.u32 %v4729_v48, %v3941_v47  ;;  %v1410_v14 = vpop.f32.mrf.mxu1  ;;  %v4005_v29 = vld [vmem:[#allocation8 + $0x100] sm:$0xf]  ;;  %v4805_v48 = vld [vmem:[#allocation8 + $0x2ec] sm:$0xf0] }
  0xe7   :  { %2511 = vmatpush.bf16.msrb.mxu3 %v3990_v24  ;;  %1687 = vmatmul.bf16.vlgmr.msra.gmra.mxu2 %v5154_v37  ;;  %v1369_v37 = vadd.f32 %v1368_v41, %v1355_v46  ;;  %v4006_v38 = vor.u32 %v4745_v30, %v4005_v29  ;;  %v4122_v41 = vor.u32 %v4771_v32, %v4119_v8  ;;  %v4245_v47 = vld [vmem:[#allocation8 + $0x2e0] sm:$0xf]  ;;  %v3895_v29 = vld [vmem:[#allocation8 + $0x30] sm:$0xf0]  ;;  %v4747_v8 = vld [vmem:[#allocation8 + $0x124] sm:$0xf] }
  0xe8   :  { %v4246_v53 = vor.u32 %v4805_v48, %v4245_v47  ;;  %v4742_v48 = vld [vmem:[#allocation8 + $0xf4] sm:$0xf0] }
  0xe9   :  { %v1383_v3 = vadd.f32 %v1382_v62, %v1369_v37  ;;  %v4229_v37 = vld [vmem:[#allocation8 + $0x2c0] sm:$0xf] }
  0xea   :  { %2526 = vmatpush.bf16.msrb.mxu1 %v4102_v40  ;;  %v3975_v40 = vld [vmem:[#allocation8 + $0xd0] sm:$0xf0]  ;;  %2539 = vmatpush.bf16.msrb.mxu2 %v4246_v53  ;;  %v4230_v61 = vor.u32 %v4801_v58, %v4229_v37  ;;  %v4781_v37 = vld [vmem:[#allocation8 + $0x22c] sm:$0xf0] }
  0xeb   :  { %2512 = vmatpush.bf16.msrb.mxu3 %v3974_v34  ;;  %v1397_v13 = vadd.f32 %v1396_v7, %v1383_v3  ;;  %v3978_v46 = vor.u32 %v4735_v39, %v3975_v40  ;;  %v1450_v63 = vpop.f32.mrf.mxu2  ;;  %v3927_v7 = vld [vmem:[#allocation8 + $0x70] sm:$0xf0]  ;;  %v4165_v39 = vld [vmem:[#allocation8 + $0x240] sm:$0xf]  ;;  %v4785_v40 = vld [vmem:[#allocation8 + $0x24c] sm:$0xf0] }
  0xed   :  { %v1411_v16 = vadd.f32 %v1410_v14, %v1397_v13  ;;  %v1438_v0 = vpop.f32.mrf.mxu3  ;;  %v4055_v13 = vld [vmem:[#allocation8 + $0x170] sm:$0xf0] }
  0xee   :  { %2527 = vmatpush.bf16.msrb.mxu1 %v4086_v49  ;;  %v4731_v49 = vld [vmem:[#allocation8 + $0xa4] sm:$0xf]  ;;  %2540 = vmatpush.bf16.msrb.mxu2 %v4230_v61  ;;  %v4058_v18 = vor.u32 %v4755_v12, %v4055_v13  ;;  %v3981_v61 = vld [vmem:[#allocation8 + $0xc8] sm:$0xf]  ;;  %v4734_v13 = vld [vmem:[#allocation8 + $0xb4] sm:$0xf0] }
  0xef   :  { %2513 = vmatpush.bf16.msrb.mxu3 %v3958_v54  ;;  %v1425_v24 = vadd.f32 %v1424_v23, %v1411_v16  ;;  %v4103_v54 = vld [vmem:[#allocation8 + $0x1d0] sm:$0xf0]  ;;  %v3962_v57 = vor.u32 %v4731_v49, %v3959_v51  ;;  %v4719_v16 = vld [vmem:[#allocation8 + $0x44] sm:$0xf]  ;;  %v3965_v12 = vld [vmem:[#allocation8 + $0xa8] sm:$0xf] }
  0xf0   :  { %v4106_v52 = vor.u32 %v4767_v44, %v4103_v54  ;;  %v4039_v23 = vld [vmem:[#allocation8 + $0x150] sm:$0xf0]  ;;  %v3914_v26 = vor.u32 %v4719_v16, %v3911_v17  ;;  %v3997_v44 = vld [vmem:[#allocation8 + $0xe8] sm:$0xf]  ;;  %v4743_v49 = vld [vmem:[#allocation8 + $0x104] sm:$0xf] }
  0xf1   :  { %3874 = vmatmul.msk.bf16.vlgmr.msra.gmra.mxu1 %vm1325_vm0, %v5150_v50  ;;  %v4022_v50 = vor.u32 %v4749_v21, %v4021_v20  ;;  %v1725_v34 = vmax.f32 %v1425_v24, 0.0  ;;  %v338_v24 = vperm.slane %v5180_v9, 1  ;;  %v4042_v30 = vor.u32 %v4751_v22, %v4039_v23  ;;  %v4007_v51 = vld [vmem:[#allocation8 + $0x110] sm:$0xf0] }
  0xf2   :  { %2528 = vmatpush.bf16.msrb.mxu1 %v4070_v42  ;;  %v3943_v42 = vld [vmem:[#allocation8 + $0x90] sm:$0xf0]  ;;  %2541 = vmatpush.bf16.msrb.mxu2 %v4214_v10 }
  0xf3   :  { %2514 = vmatpush.bf16.msrb.mxu3 %v3942_v60  ;;  %v5195_v45 = vpack.c.bf16 %v1725_v34, %v1721_v43  ;;  %v4087_v60 = vld [vmem:[#allocation8 + $0x1b0] sm:$0xf0]  ;;  %v3946_v3 = vor.u32 %v4727_v59, %v3943_v42  ;;  %v1452_v25 = vpop.f32.mrf.mxu2  ;;  %v1437_v34 = vadd.f32 %v5193_v35, %v338_v24  ;;  %v3998_v59 = vor.u32 %v4742_v48, %v3997_v44  ;;  %v3917_v44 = vld [vmem:[#allocation8 + $0x48] sm:$0xf]  ;;  %v4722_v48 = vld [vmem:[#allocation8 + $0x54] sm:$0xf0] }
  0xf4   :  { %v4090_v62 = vor.u32 %v4763_v56, %v4087_v60  ;;  %v3879_v43 = vld [vmem:[#allocation8 + $0x10] sm:$0xf0]  ;;  %v4010_v42 = vor.u32 %v4743_v49, %v4007_v51  ;;  %v4791_v49 = vld [vmem:[#allocation8 + $0x284] sm:$0xf] }
  0xf5   :  { %v4231_v22 = vld [vmem:[#allocation8 + $0x2d0] sm:$0xf0] }
  0xf6   :  { %2529 = vmatpush.bf16.msrb.mxu1 %v4054_v6  ;;  %v4723_v6 = vld [vmem:[#allocation8 + $0x64] sm:$0xf] }
  0xf7   :  { %2515 = vmatpush.bf16.msrb.mxu3 %v3926_v1  ;;  %v4759_v1 = vld [vmem:[#allocation8 + $0x184] sm:$0xf]  ;;  %v3930_v14 = vor.u32 %v4723_v6, %v3927_v7 }
  0xf8   :  { %v4074_v11 = vor.u32 %v4759_v1, %v4071_v2  ;;  %v4803_v7 = vld [vmem:[#allocation8 + $0x2e4] sm:$0xf] }
  0xfa   :  { %2530 = vmatpush.bf16.msrb.mxu1 %v4038_v19  ;;  %v4793_v19 = vld [vmem:[#allocation8 + $0x28c] sm:$0xf0] }
  0xfb   :  { %2516 = vmatpush.bf16.msrb.mxu3 %v3910_v15  ;;  %v4197_v15 = vld [vmem:[#allocation8 + $0x280] sm:$0xf] }
  0xfd   :  { %v1464_v20 = vpop.f32.mrf.mxu0 }
  0xfe   :  { %2531 = vmatpush.bf16.msrb.mxu1 %v4022_v50  ;;  %v4789_v50 = vld [vmem:[#allocation8 + $0x26c] sm:$0xf0]  ;;  %v1478_v32 = vpop.f32.mrf.mxu1 }
  0xff   :  { %2517 = vmatpush.bf16.msrb.mxu3 %v3894_v55  ;;  %v4198_v55 = vor.u32 %v4793_v19, %v4197_v15  ;;  %v4182_v31 = vor.u32 %v4789_v50, %v4181_v27  ;;  %v3949_v19 = vld [vmem:[#allocation8 + $0x88] sm:$0xf] }
 0x101   :  { %2542 = vmatpush.bf16.msrb.mxu2 %v4198_v55  ;;  %v4730_v55 = vld [vmem:[#allocation8 + $0x94] sm:$0xf0] }
 0x102   :  { %2532 = vmatpush.bf16.msrb.mxu1 %v4006_v38  ;;  %v3898_v38 = vor.u32 %v4715_v28, %v3895_v29  ;;  %v3950_v29 = vor.u32 %v4730_v55, %v3949_v19  ;;  %v4821_v19 = vld [vmem:[#allocation8 + $0x36c] sm:$0xf0]  ;;  %v3999_v55 = vld [vmem:[#allocation8 + $0xf8] sm:$0xf0] }
 0x103   :  { %2518 = vmatpush.bf16.msrb.mxu3 %v3878_v33  ;;  %v4023_v33 = vld [vmem:[#allocation8 + $0x130] sm:$0xf0] }
 0x104   :  { %v4026_v54 = vor.u32 %v4747_v8, %v4023_v33  ;;  %v4726_v33 = vld [vmem:[#allocation8 + $0x74] sm:$0xf0] }
 0x105   :  { %v5198_v21 = vpop.f32.mrf.mxu3  ;;  %2543 = vmatpush.bf16.msrb.mxu2 %v4182_v31  ;;  %v1466_v56 = vpop.f32.mrf.mxu0  ;;  %v4795_v31 = vld [vmem:[#allocation8 + $0x2a4] sm:$0xf] }
 0x106   :  { %2581 = vmatpush.bf16.msra.mxu1 %v4122_v41  ;;  %2519 = vmatmul.bf16.vlgmr.msrb.gmra.mxu3 %v5195_v45  ;;  %v4711_v41 = vld [vmem:[#allocation8 + $0x4] sm:$0xf]  ;;  %v1480_v2 = vpop.f32.mrf.mxu1 }
 0x107   :  { %2567 = vmatpush.bf16.msra.mxu3 %v3994_v36  ;;  %v1439_v36 = vadd.f32 %v1438_v0, %v338_v24  ;;  %v3882_v60 = vor.u32 %v4711_v41, %v3879_v43  ;;  %v4738_v0 = vld [vmem:[#allocation8 + $0xd4] sm:$0xf0] }
 0x108   :  { %v3982_v5 = vor.u32 %v4738_v0, %v3981_v61  ;;  %v4774_v41 = vld [vmem:[#allocation8 + $0x1f4] sm:$0xf0]  ;;  %v4183_v61 = vld [vmem:[#allocation8 + $0x270] sm:$0xf0] }
 0x109   :  { %v1453_v53 = vadd.f32 %v1452_v25, %v1439_v36  ;;  %v4373_v25 = vld [vmem:[#allocation8 + $0x3e0] sm:$0xf] }
 0x10a   :  { %2582 = vmatpush.bf16.msra.mxu1 %v4106_v52  ;;  %v1451_v52 = vadd.f32 %v1450_v63, %v1437_v34  ;;  %v1506_v35 = vpop.f32.mrf.mxu2  ;;  %v4133_v63 = vld [vmem:[#allocation8 + $0x200] sm:$0xf] }
 0x10b   :  { %2568 = vmatpush.bf16.msra.mxu3 %v3978_v46  ;;  %v4166_v46 = vor.u32 %v4785_v40, %v4165_v39  ;;  %v1467_v1 = vadd.f32 %v1466_v56, %v1453_v53  ;;  %v4357_v36 = vld [vmem:[#allocation8 + $0x3c0] sm:$0xf]  ;;  %v4125_v40 = vld [vmem:[#allocation8 + $0x1e8] sm:$0xf]  ;;  %v4829_v56 = vld [vmem:[#allocation8 + $0x3ac] sm:$0xf0] }
 0x10c   :  { %v1465_v58 = vadd.f32 %v1464_v20, %v1451_v52  ;;  %v4799_v20 = vld [vmem:[#allocation8 + $0x2c4] sm:$0xf]  ;;  %v4126_v51 = vor.u32 %v4774_v41, %v4125_v40  ;;  %v4199_v52 = vld [vmem:[#allocation8 + $0x290] sm:$0xf0]  ;;  %v4341_v53 = vld [vmem:[#allocation8 + $0x3a0] sm:$0xf] }
 0x10d   :  { %v1494_v47 = vpop.f32.mrf.mxu3  ;;  %2544 = vmatpush.bf16.msrb.mxu2 %v4166_v46  ;;  %v1481_v16 = vadd.f32 %v1480_v2, %v1467_v1  ;;  %v4234_v24 = vor.u32 %v4799_v20, %v4231_v22  ;;  %v4718_v1 = vld [vmem:[#allocation8 + $0x34] sm:$0xf0] }
 0x10e   :  { %2583 = vmatpush.bf16.msra.mxu1 %v4090_v62  ;;  %v1479_v4 = vadd.f32 %v1478_v32, %v1465_v58  ;;  %v4215_v32 = vld [vmem:[#allocation8 + $0x2b0] sm:$0xf0]  ;;  %v4342_v58 = vor.u32 %v4829_v56, %v4341_v53  ;;  %v4762_v22 = vld [vmem:[#allocation8 + $0x194] sm:$0xf0]  ;;  %v339_v53 = vperm.slane %v5180_v9, 2 }
 0x10f   :  { %2569 = vmatpush.bf16.msra.mxu3 %v3962_v57  ;;  %v4149_v57 = vld [vmem:[#allocation8 + $0x220] sm:$0xf]  ;;  %v1495_v17 = vadd.f32 %v1494_v47, %v1481_v16  ;;  %v4218_v34 = vor.u32 %v4795_v31, %v4215_v32  ;;  %v4077_v16 = vld [vmem:[#allocation8 + $0x188] sm:$0xf]  ;;  %v4758_v31 = vld [vmem:[#allocation8 + $0x174] sm:$0xf0] }
 0x110   :  { %v4150_v62 = vor.u32 %v4781_v37, %v4149_v57  ;;  %v1493_v15 = vadd.f32 %v5198_v21, %v1479_v4  ;;  %v4770_v57 = vld [vmem:[#allocation8 + $0x1d4] sm:$0xf0]  ;;  %v4202_v37 = vor.u32 %v4791_v49, %v4199_v52  ;;  %v4093_v4 = vld [vmem:[#allocation8 + $0x1a8] sm:$0xf]  ;;  %v4736_v32 = vld [vmem:[#allocation8 + $0xcc] sm:$0xf] }
 0x111   :  { %v3967_v49 = vld [vmem:[#allocation8 + $0xb8] sm:$0xf0] }
 0x112   :  { %2584 = vmatpush.bf16.msra.mxu1 %v4074_v11  ;;  %2545 = vmatpush.bf16.msrb.mxu2 %v4150_v62  ;;  %v4247_v11 = vld [vmem:[#allocation8 + $0x2f0] sm:$0xf0]  ;;  %v1508_v23 = vpop.f32.mrf.mxu2  ;;  %v1507_v27 = vadd.f32 %v1506_v35, %v1493_v15  ;;  %v4787_v62 = vld [vmem:[#allocation8 + $0x264] sm:$0xf] }
 0x113   :  { %2570 = vmatpush.bf16.msra.mxu3 %v3946_v3  ;;  %v4777_v3 = vld [vmem:[#allocation8 + $0x20c] sm:$0xf0]  ;;  %v1509_v28 = vadd.f32 %v1508_v23, %v1495_v17  ;;  %v4186_v2 = vor.u32 %v4787_v62, %v4183_v61  ;;  %v4740_v23 = vld [vmem:[#allocation8 + $0xec] sm:$0xf]  ;;  %v3951_v61 = vld [vmem:[#allocation8 + $0x98] sm:$0xf0] }
 0x114   :  { %v4134_v6 = vor.u32 %v4777_v3, %v4133_v63  ;;  %v4325_v63 = vld [vmem:[#allocation8 + $0x380] sm:$0xf]  ;;  %v4825_v3 = vld [vmem:[#allocation8 + $0x38c] sm:$0xf0] }
 0x115   :  { %v1520_v10 = vpop.f32.mrf.mxu3  ;;  %v4809_v62 = vld [vmem:[#allocation8 + $0x30c] sm:$0xf0] }
 0x116   :  { %2585 = vmatpush.bf16.msra.mxu1 %v4058_v18  ;;  %2546 = vmatpush.bf16.msrb.mxu2 %v4134_v6  ;;  %v3966_v18 = vor.u32 %v4734_v13, %v3965_v12  ;;  %v1521_v21 = vadd.f32 %v1520_v10, %v1507_v27  ;;  %v4326_v6 = vor.u32 %v4825_v3, %v4325_v63  ;;  %v4714_v12 = vld [vmem:[#allocation8 + $0x14] sm:$0xf0]  ;;  %v4783_v13 = vld [vmem:[#allocation8 + $0x244] sm:$0xf]  ;;  %v4151_v27 = vld [vmem:[#allocation8 + $0x230] sm:$0xf0] }
 0x117   :  { %2571 = vmatpush.bf16.msra.mxu3 %v3930_v14  ;;  %v4250_v14 = vor.u32 %v4803_v7, %v4247_v11  ;;  %v3885_v11 = vld [vmem:[#allocation8 + $0x8] sm:$0xf] }
 0x11a   :  { %2586 = vmatpush.bf16.msra.mxu1 %v4042_v30  ;;  %2595 = vmatpush.bf16.msra.mxu2 %v4250_v14  ;;  %v3933_v30 = vld [vmem:[#allocation8 + $0x68] sm:$0xf]  ;;  %v4167_v14 = vld [vmem:[#allocation8 + $0x250] sm:$0xf0] }
 0x11b   :  { %2572 = vmatpush.bf16.msra.mxu3 %v3914_v26  ;;  %v4837_v26 = vld [vmem:[#allocation8 + $0x3ec] sm:$0xf0]  ;;  %v3934_v47 = vor.u32 %v4726_v33, %v3933_v30  ;;  %v4170_v17 = vor.u32 %v4783_v13, %v4167_v14 }
 0x11c   :  { %v4374_v50 = vor.u32 %v4837_v26, %v4373_v25  ;;  %v3886_v25 = vor.u32 %v4714_v12, %v3885_v11  ;;  %v4779_v26 = vld [vmem:[#allocation8 + $0x224] sm:$0xf]  ;;  %v4817_v30 = vld [vmem:[#allocation8 + $0x34c] sm:$0xf0]  ;;  %v4013_v11 = vld [vmem:[#allocation8 + $0x108] sm:$0xf] }
 0x11d   :  { %v1522_v8 = vpop.f32.mrf.mxu3  ;;  %v5207_v7 = vpop.f32.mrf.mxu0  ;;  %v4154_v33 = vor.u32 %v4779_v26, %v4151_v27  ;;  %v4724_v12 = vld [vmem:[#allocation8 + $0x6c] sm:$0xf] }
 0x11e   :  { %2587 = vmatpush.bf16.msra.mxu1 %v4026_v54  ;;  %2596 = vmatpush.bf16.msra.mxu2 %v4234_v24  ;;  %v1523_v39 = vadd.f32 %v1522_v8, %v1509_v28  ;;  %v1722_v54 = vmax.f32 %v1521_v21, 0.0  ;;  %v1534_v20 = vpop.f32.mrf.mxu1  ;;  %v4002_v28 = vor.u32 %v4740_v23, %v3999_v55  ;;  %v4061_v21 = vld [vmem:[#allocation8 + $0x168] sm:$0xf]  ;;  %v3983_v8 = vld [vmem:[#allocation8 + $0xd8] sm:$0xf0] }
 0x11f   :  { %2573 = vmatpush.bf16.msra.mxu3 %v3898_v38  ;;  %2553 = vmatpush.bf16.msrb.mxu0 %v4374_v50  ;;  %v4833_v38 = vld [vmem:[#allocation8 + $0x3cc] sm:$0xf0]  ;;  %v4078_v50 = vor.u32 %v4762_v22, %v4077_v16  ;;  %v4062_v41 = vor.u32 %v4758_v31, %v4061_v21  ;;  %v1535_v63 = vadd.f32 %v1534_v20, %v339_v53  ;;  %v4831_v16 = vld [vmem:[#allocation8 + $0x3c4] sm:$0xf]  ;;  %v4772_v22 = vld [vmem:[#allocation8 + $0x1ec] sm:$0xf] }
 0x120   :  { %v4358_v43 = vor.u32 %v4833_v38, %v4357_v36  ;;  %v1726_v46 = vmax.f32 %v1523_v39, 0.0  ;;  %v4775_v38 = vld [vmem:[#allocation8 + $0x204] sm:$0xf]  ;;  %v4135_v39 = vld [vmem:[#allocation8 + $0x210] sm:$0xf0] }
 0x121   :  { %v4127_v20 = vld [vmem:[#allocation8 + $0x1f8] sm:$0xf0]  ;;  %v4720_v26 = vld [vmem:[#allocation8 + $0x4c] sm:$0xf]  ;;  %v4343_v21 = vld [vmem:[#allocation8 + $0x3b0] sm:$0xf0] }
 0x122   :  { %2588 = vmatpush.bf16.msra.mxu1 %v4010_v42  ;;  %2597 = vmatpush.bf16.msra.mxu2 %v4218_v34  ;;  %v5204_v35 = vpack.c.bf16 %v1726_v46, %v1722_v54  ;;  %v3901_v42 = vld [vmem:[#allocation8 + $0x28] sm:$0xf]  ;;  %v4277_v54 = vld [vmem:[#allocation8 + $0x320] sm:$0xf]  ;;  %v4813_v46 = vld [vmem:[#allocation8 + $0x32c] sm:$0xf0]  ;;  %v4130_v27 = vor.u32 %v4772_v22, %v4127_v20 }
 0x123   :  { %2574 = vmatpush.bf16.msra.mxu3 %v3882_v60  ;;  %2554 = vmatpush.bf16.msrb.mxu0 %v4358_v43  ;;  %v4109_v60 = vld [vmem:[#allocation8 + $0x1c8] sm:$0xf]  ;;  %v3902_v10 = vor.u32 %v4718_v1, %v3901_v42  ;;  %v3986_v43 = vor.u32 %v4736_v32, %v3983_v8  ;;  %v4278_v52 = vor.u32 %v4813_v46, %v4277_v54  ;;  %v4261_v42 = vld [vmem:[#allocation8 + $0x300] sm:$0xf]  ;;  %v4835_v1 = vld [vmem:[#allocation8 + $0x3e4] sm:$0xf] }
 0x124   :  { %2533 = vmatmul.bf16.vlgmr.msrb.gmra.mxu1 %v5204_v35  ;;  %v4110_v0 = vor.u32 %v4770_v57, %v4109_v60  ;;  %v4029_v60 = vld [vmem:[#allocation8 + $0x128] sm:$0xf]  ;;  %v4750_v57 = vld [vmem:[#allocation8 + $0x134] sm:$0xf0]  ;;  %v4768_v31 = vld [vmem:[#allocation8 + $0x1cc] sm:$0xf] }
 0x125   :  { %v5209_v40 = vpop.f32.mrf.mxu0  ;;  %v4111_v32 = vld [vmem:[#allocation8 + $0x1d8] sm:$0xf0]  ;;  %v4811_v22 = vld [vmem:[#allocation8 + $0x324] sm:$0xf]  ;;  %v4279_v20 = vld [vmem:[#allocation8 + $0x330] sm:$0xf0] }
 0x126   :  { %2575 = vmatmul.bf16.vlgmr.msra.gmra.mxu3 %v5195_v45  ;;  %2637 = vmatpush.bf16.msrb.mxu1 %v4126_v51  ;;  %v4138_v51 = vor.u32 %v4775_v38, %v4135_v39  ;;  %v1536_v56 = vpop.f32.mrf.mxu1  ;;  %v4114_v38 = vor.u32 %v4768_v31, %v4111_v32  ;;  %v3903_v39 = vld [vmem:[#allocation8 + $0x38] sm:$0xf0]  ;;  %v340_v31 = vperm.slane %v5180_v9, 3  ;;  %v4748_v32 = vld [vmem:[#allocation8 + $0x12c] sm:$0xf] }
 0x127   :  { %2623 = vmatpush.bf16.msrb.mxu3 %v3998_v59  ;;  %v3918_v59 = vor.u32 %v4722_v48, %v3917_v44  ;;  %2598 = vmatpush.bf16.msra.mxu2 %v4202_v37  ;;  %v4045_v44 = vld [vmem:[#allocation8 + $0x148] sm:$0xf]  ;;  %v4732_v48 = vld [vmem:[#allocation8 + $0xac] sm:$0xf] }
 0x128   :  { %2555 = vmatpush.bf16.msrb.mxu0 %v4342_v58  ;;  %v3970_v58 = vor.u32 %v4732_v48, %v3967_v49 }
 0x129   :  { %v1548_v36 = vpop.f32.mrf.mxu3 }
 0x12a   :  { %2638 = vmatpush.bf16.msrb.mxu1 %v4110_v0  ;;  %v4262_v0 = vor.u32 %v4809_v62, %v4261_v42  ;;  %v1576_v13 = vpop.f32.mrf.mxu2  ;;  %v4760_v42 = vld [vmem:[#allocation8 + $0x18c] sm:$0xf]  ;;  %v4079_v62 = vld [vmem:[#allocation8 + $0x198] sm:$0xf0] }
 0x12b   :  { %2624 = vmatpush.bf16.msrb.mxu3 %v3982_v5  ;;  %v4766_v5 = vld [vmem:[#allocation8 + $0x1b4] sm:$0xf0]  ;;  %2599 = vmatpush.bf16.msra.mxu2 %v4186_v2  ;;  %v4375_v2 = vld [vmem:[#allocation8 + $0x3f0] sm:$0xf0] }
 0x12c   :  { %v4094_v15 = vor.u32 %v4766_v5, %v4093_v4  ;;  %2556 = vmatpush.bf16.msrb.mxu0 %v4326_v6  ;;  %v4378_v3 = vor.u32 %v4835_v1, %v4375_v2  ;;  %v4030_v5 = vor.u32 %v4750_v57, %v4029_v60  ;;  %v3887_v57 = vld [vmem:[#allocation8 + $0x18] sm:$0xf0] }
 0x12d   :  { %v5214_v4 = vpop.f32.mrf.mxu0 }
 0x12e   :  { %2639 = vmatpush.bf16.msrb.mxu1 %v4094_v15  ;;  %v3935_v15 = vld [vmem:[#allocation8 + $0x78] sm:$0xf0] }
 0x12f   :  { %2625 = vmatpush.bf16.msrb.mxu3 %v3966_v18  ;;  %v4309_v18 = vld [vmem:[#allocation8 + $0x360] sm:$0xf]  ;;  %2600 = vmatpush.bf16.msra.mxu2 %v4170_v17  ;;  %v4359_v17 = vld [vmem:[#allocation8 + $0x3d0] sm:$0xf0] }
 0x130   :  { %v4310_v24 = vor.u32 %v4821_v19, %v4309_v18  ;;  %v1549_v18 = vadd.f32 %v1548_v36, %v1535_v63  ;;  %v1537_v19 = vadd.f32 %v1536_v56, %v339_v53  ;;  %v4362_v23 = vor.u32 %v4831_v16, %v4359_v17  ;;  %v4712_v53 = vld [vmem:[#allocation8 + $0xc] sm:$0xf]  ;;  %v4253_v16 = vld [vmem:[#allocation8 + $0x2e8] sm:$0xf]  ;;  %v4806_v17 = vld [vmem:[#allocation8 + $0x2f4] sm:$0xf0] }
 0x131   :  { %v1550_v14 = vpop.f32.mrf.mxu3  ;;  %v3890_v1 = vor.u32 %v4712_v53, %v3887_v57  ;;  %v4082_v63 = vor.u32 %v4760_v42, %v4079_v62  ;;  %v4790_v53 = vld [vmem:[#allocation8 + $0x274] sm:$0xf0]  ;;  %v4173_v62 = vld [vmem:[#allocation8 + $0x248] sm:$0xf] }
 0x132   :  { %2557 = vmatpush.bf16.msrb.mxu0 %v4310_v24  ;;  %2640 = vmatpush.bf16.msrb.mxu1 %v4078_v50  ;;  %v3919_v50 = vld [vmem:[#allocation8 + $0x58] sm:$0xf0]  ;;  %v1578_v49 = vpop.f32.mrf.mxu2 }
 0x133   :  { %2626 = vmatpush.bf16.msrb.mxu3 %v3950_v29  ;;  %v4293_v29 = vld [vmem:[#allocation8 + $0x340] sm:$0xf]  ;;  %2601 = vmatpush.bf16.msra.mxu2 %v4154_v33  ;;  %v3922_v33 = vor.u32 %v4720_v26, %v3919_v50  ;;  %v4254_v26 = vor.u32 %v4806_v17, %v4253_v16  ;;  %v4237_v50 = vld [vmem:[#allocation8 + $0x2c8] sm:$0xf]  ;;  %v4804_v17 = vld [vmem:[#allocation8 + $0x2ec] sm:$0xf] }
 0x134   :  { %v4294_v34 = vor.u32 %v4817_v30, %v4293_v29  ;;  %2589 = vmatmul.bf16.vlgmr.msra.gmra.mxu1 %v5204_v35  ;;  %v1563_v29 = vadd.f32 %v5207_v7, %v1549_v18  ;;  %v1551_v30 = vadd.f32 %v1550_v14, %v1537_v19  ;;  %v4764_v7 = vld [vmem:[#allocation8 + $0x1ac] sm:$0xf] }
 0x135   :  { %v1620_v46 = vpop.f32.mrf.mxu0 }
 0x136   :  { %2558 = vmatpush.bf16.msrb.mxu0 %v4294_v34  ;;  %2641 = vmatpush.bf16.msrb.mxu1 %v4062_v41  ;;  %v4716_v34 = vld [vmem:[#allocation8 + $0x2c] sm:$0xf]  ;;  %v4823_v41 = vld [vmem:[#allocation8 + $0x384] sm:$0xf]  ;;  %v1565_v54 = vadd.f32 %v5209_v40, %v1551_v30  ;;  %v4263_v30 = vld [vmem:[#allocation8 + $0x310] sm:$0xf0] }
 0x137   :  { %2627 = vmatpush.bf16.msrb.mxu3 %v3934_v47  ;;  %v4754_v47 = vld [vmem:[#allocation8 + $0x154] sm:$0xf0]  ;;  %2602 = vmatpush.bf16.msra.mxu2 %v4138_v51 }
 0x138   :  { %v4046_v37 = vor.u32 %v4754_v47, %v4045_v44  ;;  %v1577_v44 = vadd.f32 %v1576_v13, %v1563_v29  ;;  %v4095_v47 = vld [vmem:[#allocation8 + $0x1b8] sm:$0xf0]  ;;  %v4807_v29 = vld [vmem:[#allocation8 + $0x304] sm:$0xf] }
 0x139   :  { %v4098_v60 = vor.u32 %v4764_v7, %v4095_v47  ;;  %v4205_v7 = vld [vmem:[#allocation8 + $0x288] sm:$0xf]  ;;  %v4794_v47 = vld [vmem:[#allocation8 + $0x294] sm:$0xf0] }
 0x13a   :  { %2559 = vmatpush.bf16.msrb.mxu0 %v4278_v52  ;;  %2642 = vmatpush.bf16.msrb.mxu1 %v4046_v37  ;;  %v3906_v52 = vor.u32 %v4716_v34, %v3903_v39  ;;  %v4819_v37 = vld [vmem:[#allocation8 + $0x364] sm:$0xf] }
 0x13b   :  { %2628 = vmatpush.bf16.msrb.mxu3 %v3918_v59  ;;  %v4728_v59 = vld [vmem:[#allocation8 + $0x8c] sm:$0xf] }
 0x13c   :  { %v3954_v6 = vor.u32 %v4728_v59, %v3951_v61  ;;  %v1579_v59 = vadd.f32 %v1578_v49, %v1565_v54  ;;  %v4015_v54 = vld [vmem:[#allocation8 + $0x118] sm:$0xf0] }
 0x13e   :  { %2560 = vmatpush.bf16.msrb.mxu0 %v4262_v0  ;;  %v1590_v55 = vpop.f32.mrf.mxu1  ;;  %2643 = vmatpush.bf16.msrb.mxu1 %v4030_v5  ;;  %v4295_v5 = vld [vmem:[#allocation8 + $0x350] sm:$0xf0] }
 0x13f   :  { %2629 = vmatpush.bf16.msrb.mxu3 %v3902_v10  ;;  %v4746_v10 = vld [vmem:[#allocation8 + $0x114] sm:$0xf0]  ;;  %v1591_v51 = vadd.f32 %v1590_v55, %v1577_v44  ;;  %v4744_v44 = vld [vmem:[#allocation8 + $0x10c] sm:$0xf] }
 0x140   :  { %v4014_v24 = vor.u32 %v4746_v10, %v4013_v11  ;;  %v4756_v10 = vld [vmem:[#allocation8 + $0x16c] sm:$0xf] }
 0x142   :  { %2609 = vmatpush.bf16.msra.mxu0 %v4378_v3  ;;  %2644 = vmatpush.bf16.msrb.mxu1 %v4014_v24  ;;  %v4815_v3 = vld [vmem:[#allocation8 + $0x344] sm:$0xf]  ;;  %v4752_v24 = vld [vmem:[#allocation8 + $0x14c] sm:$0xf] }
 0x143   :  { %2630 = vmatpush.bf16.msrb.mxu3 %v3886_v25  ;;  %v3938_v25 = vor.u32 %v4724_v12, %v3935_v15  ;;  %v4063_v12 = vld [vmem:[#allocation8 + $0x178] sm:$0xf0]  ;;  %v4298_v13 = vor.u32 %v4815_v3, %v4295_v5  ;;  %v1646_v15 = vpop.f32.mrf.mxu0  ;;  %v4782_v3 = vld [vmem:[#allocation8 + $0x234] sm:$0xf0] }
 0x144   :  { %v4066_v19 = vor.u32 %v4756_v10, %v4063_v12 }
 0x145   :  { %2645 = vmatmul.bf16.vlgmr.msrb.gmra.mxu1 %v5204_v35 }
 0x146   :  { %2631 = vmatmul.bf16.vlgmr.msrb.gmra.mxu3 %v5195_v45  ;;  %2610 = vmatpush.bf16.msra.mxu0 %v4362_v23  ;;  %v1592_v56 = vpop.f32.mrf.mxu1 }
 0x147   :  { %2679 = vmatpush.bf16.msra.mxu3 %v4002_v28  ;;  %v4827_v28 = vld [vmem:[#allocation8 + $0x3a4] sm:$0xf]  ;;  %2693 = vmatpush.bf16.msra.mxu1 %v4130_v27  ;;  %v1593_v0 = vadd.f32 %v1592_v56, %v1579_v59 }
 0x148   :  { %v4346_v8 = vor.u32 %v4827_v28, %v4343_v21  ;;  %v4802_v28 = vld [vmem:[#allocation8 + $0x2d4] sm:$0xf0] }
 0x149   :  { %v1604_v36 = vpop.f32.mrf.mxu3  ;;  %v4238_v34 = vor.u32 %v4802_v28, %v4237_v50  ;;  %v4381_v50 = vld [vmem:[#allocation8 + $0x3e8] sm:$0xf]  ;;  %v4838_v28 = vld [vmem:[#allocation8 + $0x3f4] sm:$0xf0] }
 0x14a   :  { %2611 = vmatpush.bf16.msra.mxu0 %v4346_v8  ;;  %v1605_v40 = vadd.f32 %v1604_v36, %v1591_v51  ;;  %v1632_v18 = vpop.f32.mrf.mxu2  ;;  %v4031_v8 = vld [vmem:[#allocation8 + $0x138] sm:$0xf0]  ;;  %v4798_v36 = vld [vmem:[#allocation8 + $0x2b4] sm:$0xf0]  ;;  %v4206_v51 = vor.u32 %v4794_v47, %v4205_v7  ;;  %v4333_v47 = vld [vmem:[#allocation8 + $0x388] sm:$0xf] }
 0x14b   :  { %2680 = vmatpush.bf16.msra.mxu3 %v3986_v43  ;;  %v4327_v43 = vld [vmem:[#allocation8 + $0x390] sm:$0xf0]  ;;  %2694 = vmatpush.bf16.msra.mxu1 %v4114_v38  ;;  %v4034_v39 = vor.u32 %v4748_v32, %v4031_v8  ;;  %v4796_v32 = vld [vmem:[#allocation8 + $0x2ac] sm:$0xf]  ;;  %v4223_v8 = vld [vmem:[#allocation8 + $0x2b8] sm:$0xf0] }
 0x14c   :  { %v4330_v48 = vor.u32 %v4823_v41, %v4327_v43  ;;  %v1633_v41 = vadd.f32 %v1632_v18, %v340_v31  ;;  %v1648_v43 = vpop.f32.mrf.mxu0  ;;  %v4255_v18 = vld [vmem:[#allocation8 + $0x2f8] sm:$0xf0] }
 0x14d   :  { %v4191_v7 = vld [vmem:[#allocation8 + $0x278] sm:$0xf0] }
 0x14e   :  { %2612 = vmatpush.bf16.msra.mxu0 %v4330_v48  ;;  %v4018_v48 = vor.u32 %v4744_v44, %v4015_v54  ;;  %v1647_v49 = vadd.f32 %v1646_v15, %v1633_v41  ;;  %v4141_v15 = vld [vmem:[#allocation8 + $0x208] sm:$0xf]  ;;  %v4207_v41 = vld [vmem:[#allocation8 + $0x298] sm:$0xf0]  ;;  %v4830_v44 = vld [vmem:[#allocation8 + $0x3b4] sm:$0xf0] }
 0x14f   :  { %2681 = vmatpush.bf16.msra.mxu3 %v3970_v58  ;;  %v4311_v58 = vld [vmem:[#allocation8 + $0x370] sm:$0xf0]  ;;  %2695 = vmatpush.bf16.msra.mxu1 %v4098_v60 }
 0x150   :  { %v4314_v61 = vor.u32 %v4819_v37, %v4311_v58 }
 0x151   :  { %v1606_v2 = vpop.f32.mrf.mxu3 }
 0x152   :  { %v1607_v11 = vadd.f32 %v1606_v2, %v1593_v0  ;;  %2613 = vmatpush.bf16.msra.mxu0 %v4314_v61  ;;  %v4786_v61 = vld [vmem:[#allocation8 + $0x254] sm:$0xf0] }
 0x153   :  { %2682 = vmatpush.bf16.msra.mxu3 %v3954_v6  ;;  %v1619_v6 = vadd.f32 %v5214_v4, %v1605_v40  ;;  %2696 = vmatpush.bf16.msra.mxu1 %v4082_v63  ;;  %v4282_v4 = vor.u32 %v4811_v22, %v4279_v20  ;;  %v4157_v63 = vld [vmem:[#allocation8 + $0x228] sm:$0xf] }
 0x154   :  { %v1621_v14 = vadd.f32 %v1620_v46, %v1607_v11  ;;  %v1634_v46 = vpop.f32.mrf.mxu2  ;;  %v4158_v12 = vor.u32 %v4782_v3, %v4157_v63  ;;  %v4814_v63 = vld [vmem:[#allocation8 + $0x334] sm:$0xf0] }
 0x155   :  { %v1723_v23 = vmax.f32 %v1619_v6, 0.0  ;;  %v1635_v37 = vadd.f32 %v1634_v46, %v340_v31  ;;  %v4382_v31 = vor.u32 %v4838_v28, %v4381_v50  ;;  %v4812_v50 = vld [vmem:[#allocation8 + $0x32c] sm:$0xf]  ;;  %v4287_v28 = vld [vmem:[#allocation8 + $0x338] sm:$0xf0] }
 0x156   :  { %v1727_v55 = vmax.f32 %v1621_v14, 0.0  ;;  %2614 = vmatpush.bf16.msra.mxu0 %v4298_v13 }
 0x157   :  { %2683 = vmatpush.bf16.msra.mxu3 %v3938_v25  ;;  %v4047_v25 = vld [vmem:[#allocation8 + $0x158] sm:$0xf0]  ;;  %2697 = vmatpush.bf16.msra.mxu1 %v4066_v19  ;;  %v1649_v0 = vadd.f32 %v1648_v43, %v1635_v37  ;;  %v4349_v43 = vld [vmem:[#allocation8 + $0x3a8] sm:$0xf] }
 0x158   :  { %v5221_v27 = vpack.c.bf16 %v1727_v55, %v1723_v23  ;;  %v4050_v21 = vor.u32 %v4752_v24, %v4047_v25  ;;  %v4258_v55 = vor.u32 %v4804_v17, %v4255_v18  ;;  %v4800_v25 = vld [vmem:[#allocation8 + $0x2cc] sm:$0xf]  ;;  %v4350_v46 = vor.u32 %v4830_v44, %v4349_v43  ;;  %v4351_v18 = vld [vmem:[#allocation8 + $0x3b8] sm:$0xf0] }
 0x159   :  { %v4828_v17 = vld [vmem:[#allocation8 + $0x3ac] sm:$0xf] }
 0x15a   :  { %2547 = vmatmul.bf16.vlgmr.msrb.gmra.mxu2 %v5221_v27  ;;  %2615 = vmatpush.bf16.msra.mxu0 %v4282_v4  ;;  %v4239_v4 = vld [vmem:[#allocation8 + $0x2d8] sm:$0xf0]  ;;  %v4840_v43 = vld [vmem:[#allocation11 + $0x8] sm:$0xff] }
 0x15b   :  { %2684 = vmatpush.bf16.msra.mxu3 %v3922_v33  ;;  %v4266_v33 = vor.u32 %v4807_v29, %v4263_v30  ;;  %2651 = vmatpush.bf16.msrb.mxu2 %v4254_v26  ;;  %v4242_v30 = vor.u32 %v4800_v25, %v4239_v4  ;;  %v4303_v4 = vld [vmem:[#allocation8 + $0x358] sm:$0xf0]  ;;  %v4852_v44 = vld [vmem:[#allocation11 + $0x68] sm:$0xff] }
 0x15c   :  { %2698 = vmatpush.bf16.msra.mxu1 %v4050_v21 }
 0x15e   :  { %v1660_v38 = vpop.f32.mrf.mxu1  ;;  %2616 = vmatpush.bf16.msra.mxu0 %v4266_v33 }
 0x15f   :  { %2685 = vmatpush.bf16.msra.mxu3 %v3906_v52  ;;  %2652 = vmatpush.bf16.msrb.mxu2 %v4238_v34  ;;  %v4189_v52 = vld [vmem:[#allocation8 + $0x268] sm:$0xf]  ;;  %v1661_v60 = vadd.f32 %v1660_v38, %v1647_v49 }
 0x160   :  { %2699 = vmatpush.bf16.msra.mxu1 %v4034_v39  ;;  %v4190_v59 = vor.u32 %v4790_v53, %v4189_v52  ;;  %v4365_v34 = vld [vmem:[#allocation8 + $0x3c8] sm:$0xf]  ;;  %v4792_v39 = vld [vmem:[#allocation8 + $0x28c] sm:$0xf]  ;;  %v4175_v53 = vld [vmem:[#allocation8 + $0x258] sm:$0xf0] }
 0x161   :  { %v1702_v40 = vpop.f32.mrf.mxu0  ;;  %v4210_v54 = vor.u32 %v4792_v39, %v4207_v41  ;;  %v4784_v52 = vld [vmem:[#allocation8 + $0x24c] sm:$0xf]  ;;  %v4841_v39 = vld [vmem:[#allocation11 + $0x10] sm:$0xff] }
 0x162   :  { %v4853_v41 = vld [vmem:[#allocation11 + $0x70] sm:$0xff] }
 0x163   :  { %2686 = vmatpush.bf16.msra.mxu3 %v3890_v1  ;;  %v4174_v1 = vor.u32 %v4786_v61, %v4173_v62 }
 0x164   :  { %2700 = vmatpush.bf16.msra.mxu1 %v4018_v48  ;;  %v4826_v48 = vld [vmem:[#allocation8 + $0x394] sm:$0xf0] }
 0x166   :  { %2687 = vmatmul.bf16.vlgmr.msra.gmra.mxu3 %v5195_v45  ;;  %v4221_v45 = vld [vmem:[#allocation8 + $0x2a8] sm:$0xf]  ;;  %v1662_v56 = vpop.f32.mrf.mxu1 }
 0x167   :  { %v4222_v9 = vor.u32 %v4798_v36, %v4221_v45  ;;  %2701 = vmatmul.bf16.vlgmr.msra.gmra.mxu1 %v5204_v35  ;;  %v1663_v5 = vadd.f32 %v1662_v56, %v1649_v0  ;;  %v4778_v35 = vld [vmem:[#allocation8 + $0x214] sm:$0xf0]  ;;  %v4226_v36 = vor.u32 %v4796_v32, %v4223_v8  ;;  %v4317_v56 = vld [vmem:[#allocation8 + $0x368] sm:$0xf]  ;;  %v4776_v0 = vld [vmem:[#allocation8 + $0x20c] sm:$0xf] }
 0x168   :  { %v4142_v20 = vor.u32 %v4778_v35, %v4141_v15  ;;  %v4834_v45 = vld [vmem:[#allocation8 + $0x3d4] sm:$0xf0]  ;;  %v4832_v15 = vld [vmem:[#allocation8 + $0x3cc] sm:$0xf]  ;;  %v4367_v35 = vld [vmem:[#allocation8 + $0x3d8] sm:$0xf0] }
 0x169   :  { %2653 = vmatpush.bf16.msrb.mxu2 %v4222_v9  ;;  %v1674_v57 = vpop.f32.mrf.mxu3  ;;  %v1704_v19 = vpop.f32.mrf.mxu0  ;;  %v4366_v38 = vor.u32 %v4834_v45, %v4365_v34  ;;  %v4788_v9 = vld [vmem:[#allocation8 + $0x26c] sm:$0xf]  ;;  %v4846_v32 = vld [vmem:[#allocation11 + $0x38] sm:$0xff]  ;;  %v4845_v8 = vld [vmem:[#allocation11 + $0x30] sm:$0xff] }
 0x16a   :  { %v1688_v58 = vpop.f32.mrf.mxu2  ;;  %v1675_v42 = vadd.f32 %v1674_v57, %v1661_v60  ;;  %2603 = vmatmul.bf16.vlgmr.msra.gmra.mxu2 %v5221_v27  ;;  %v4194_v49 = vor.u32 %v4788_v9, %v4191_v7  ;;  %v4822_v60 = vld [vmem:[#allocation8 + $0x374] sm:$0xf0]  ;;  %v4178_v57 = vor.u32 %v4784_v52, %v4175_v53  ;;  %3007 = vmatpush.bf16.msrb.mxu3 %v4846_v32  ;;  %v4844_v34 = vld [vmem:[#allocation11 + $0x28] sm:$0xff]  ;;  %v4843_v45 = vld [vmem:[#allocation11 + $0x20] sm:$0xff] }
 0x16b   :  { %v4318_v37 = vor.u32 %v4822_v60, %v4317_v56  ;;  %v4862_v9 = vld [vmem:[#allocation11 + $0xb8] sm:$0xff]  ;;  %v4848_v52 = vld [vmem:[#allocation11 + $0x48] sm:$0xff] }
 0x16c   :  { %v1689_v2 = vadd.f32 %v1688_v58, %v1675_v42  ;;  %v4780_v58 = vld [vmem:[#allocation8 + $0x22c] sm:$0xf]  ;;  %v4818_v42 = vld [vmem:[#allocation8 + $0x354] sm:$0xf0]  ;;  %v5235_v56 = vld [vmem:[#allocation10] sm:$0xf] }
 0x16d   :  { %2654 = vmatpush.bf16.msrb.mxu2 %v4206_v51  ;;  %v4334_v51 = vor.u32 %v4826_v48, %v4333_v47  ;;  %v4860_v53 = vld [vmem:[#allocation11 + $0xa8] sm:$0xff] }
 0x16e   :  { %v1716_v6 = vpop.f32.mrf.mxu1  ;;  %v1703_v13 = vadd.f32 %v1702_v40, %v1689_v2  ;;  %v4301_v40 = vld [vmem:[#allocation8 + $0x348] sm:$0xf]  ;;  %3008 = vmatpush.bf16.msrb.mxu3 %v4845_v8 }
 0x16f   :  { %v4302_v61 = vor.u32 %v4818_v42, %v4301_v40  ;;  %v4285_v2 = vld [vmem:[#allocation8 + $0x328] sm:$0xf]  ;;  %v1863_v40 = vperm.slane %v5235_v56, 0  ;;  %v4858_v42 = vld [vmem:[#allocation11 + $0x98] sm:$0xff] }
 0x170   :  { %v1717_v23 = vadd.f32 %v1716_v6, %v1703_v13  ;;  %v4269_v6 = vld [vmem:[#allocation8 + $0x308] sm:$0xf] }
 0x171   :  { %2655 = vmatpush.bf16.msrb.mxu2 %v4190_v59  ;;  %v1676_v11 = vpop.f32.mrf.mxu3  ;;  %v4159_v59 = vld [vmem:[#allocation8 + $0x238] sm:$0xf0] }
 0x172   :  { %v1677_v10 = vadd.f32 %v1676_v11, %v1663_v5  ;;  %v1690_v14 = vpop.f32.mrf.mxu2  ;;  %v1724_v21 = vmax.f32 %v1717_v23, 0.0  ;;  %v4162_v62 = vor.u32 %v4780_v58, %v4159_v59  ;;  %v4286_v5 = vor.u32 %v4814_v63, %v4285_v2  ;;  %v4810_v11 = vld [vmem:[#allocation8 + $0x314] sm:$0xf0]  ;;  %3009 = vmatpush.bf16.msrb.mxu3 %v4844_v34 }
 0x173   :  { %v4270_v13 = vor.u32 %v4810_v11, %v4269_v6  ;;  %v4857_v2 = vld [vmem:[#allocation11 + $0x90] sm:$0xff] }
 0x174   :  { %v1691_v16 = vadd.f32 %v1690_v14, %v1677_v10  ;;  %v4836_v10 = vld [vmem:[#allocation8 + $0x3ec] sm:$0xf] }
 0x175   :  { %2656 = vmatpush.bf16.msrb.mxu2 %v4174_v1  ;;  %v4143_v1 = vld [vmem:[#allocation8 + $0x218] sm:$0xf0] }
 0x176   :  { %v1705_v22 = vadd.f32 %v1704_v19, %v1691_v16  ;;  %v1718_v24 = vpop.f32.mrf.mxu1  ;;  %v4146_v3 = vor.u32 %v4776_v0, %v4143_v1  ;;  %v4370_v16 = vor.u32 %v4832_v15, %v4367_v35  ;;  %v4354_v19 = vor.u32 %v4828_v17, %v4351_v18  ;;  %3010 = vmatpush.bf16.msrb.mxu3 %v4843_v45  ;;  %v4855_v17 = vld [vmem:[#allocation11 + $0x80] sm:$0xff]  ;;  %v4870_v18 = vld [vmem:[#allocation11 + $0xf8] sm:$0xff] }
 0x178   :  { %v1719_v26 = vadd.f32 %v1718_v24, %v1705_v22  ;;  %v4824_v22 = vld [vmem:[#allocation8 + $0x38c] sm:$0xf]  ;;  %v4319_v24 = vld [vmem:[#allocation8 + $0x378] sm:$0xf0] }
 0x179   :  { %2657 = vmatpush.bf16.msrb.mxu2 %v4158_v12  ;;  %v4383_v12 = vld [vmem:[#allocation8 + $0x3f8] sm:$0xf0] }
 0x17a   :  { %v1728_v29 = vmax.f32 %v1719_v26, 0.0  ;;  %v4386_v14 = vor.u32 %v4836_v10, %v4383_v12 }
 0x17c   :  { %v5227_v33 = vpack.c.bf16 %v1728_v29, %v1724_v21  ;;  %v4290_v21 = vor.u32 %v4812_v50, %v4287_v28  ;;  %v4808_v29 = vld [vmem:[#allocation8 + $0x30c] sm:$0xf] }
 0x17d   :  { %2658 = vmatpush.bf16.msrb.mxu2 %v4142_v20  ;;  %v4335_v20 = vld [vmem:[#allocation8 + $0x398] sm:$0xf0] }
 0x17e   :  { %2561 = vmatmul.bf16.vlgmr.msrb.gmra.mxu0 %v5227_v33  ;;  %v4338_v23 = vor.u32 %v4824_v22, %v4335_v20 }
 0x17f   :  { %2665 = vmatpush.bf16.msrb.mxu0 %v4382_v31 }
 0x180   :  { %2659 = vmatmul.bf16.vlgmr.msrb.gmra.mxu2 %v5221_v27 }
 0x181   :  { %2707 = vmatpush.bf16.msra.mxu2 %v4258_v55  ;;  %v4820_v55 = vld [vmem:[#allocation8 + $0x36c] sm:$0xf] }
 0x182   :  { %v4322_v25 = vor.u32 %v4820_v55, %v4319_v24  ;;  %v4869_v55 = vld [vmem:[#allocation11 + $0xf0] sm:$0xff] }
 0x183   :  { %2666 = vmatpush.bf16.msrb.mxu0 %v4366_v38  ;;  %v4854_v38 = vld [vmem:[#allocation11 + $0x78] sm:$0xff] }
 0x184   :  { %3021 = vmatpush.bf16.msrb.mxu1 %v4854_v38 }
 0x185   :  { %2708 = vmatpush.bf16.msra.mxu2 %v4242_v30  ;;  %v4271_v30 = vld [vmem:[#allocation8 + $0x318] sm:$0xf0] }
 0x186   :  { %v4274_v31 = vor.u32 %v4808_v29, %v4271_v30  ;;  %v4867_v29 = vld [vmem:[#allocation11 + $0xe0] sm:$0xff] }
 0x187   :  { %2667 = vmatpush.bf16.msrb.mxu0 %v4350_v46  ;;  %v4850_v46 = vld [vmem:[#allocation11 + $0x58] sm:$0xff] }
 0x188   :  { %3022 = vmatpush.bf16.msrb.mxu1 %v4853_v41  ;;  %v4866_v41 = vld [vmem:[#allocation11 + $0xd8] sm:$0xff] }
 0x189   :  { %2709 = vmatpush.bf16.msra.mxu2 %v4226_v36  ;;  %v4842_v36 = vld [vmem:[#allocation11 + $0x18] sm:$0xff]  ;;  %v2520_v47 = vpop.f32.mrf.mxu3 }
 0x18a   :  { %3011 = vmatpush.bf16.msrb.mxu3 %v4842_v36 }
 0x18b   :  { %2668 = vmatpush.bf16.msrb.mxu0 %v4334_v51  ;;  %v4861_v51 = vld [vmem:[#allocation11 + $0xb0] sm:$0xff] }
 0x18c   :  { %3023 = vmatpush.bf16.msrb.mxu1 %v4852_v44 }
 0x18d   :  { %2710 = vmatpush.bf16.msra.mxu2 %v4210_v54  ;;  %v4851_v54 = vld [vmem:[#allocation11 + $0x60] sm:$0xff] }
 0x18e   :  { %2617 = vmatmul.bf16.vlgmr.msra.gmra.mxu0 %v5227_v33  ;;  %3012 = vmatpush.bf16.msrb.mxu3 %v4841_v39 }
 0x18f   :  { %2669 = vmatpush.bf16.msrb.mxu0 %v4318_v37  ;;  %v4859_v37 = vld [vmem:[#allocation11 + $0xa0] sm:$0xff] }
 0x190   :  { %3024 = vmatpush.bf16.msrb.mxu1 %v4851_v54 }
 0x191   :  { %2711 = vmatpush.bf16.msra.mxu2 %v4194_v49  ;;  %v4849_v49 = vld [vmem:[#allocation11 + $0x50] sm:$0xff]  ;;  %v2522_v58 = vpop.f32.mrf.mxu3 }
 0x192   :  { %3013 = vmatpush.bf16.msrb.mxu3 %v4840_v43  ;;  %v2523_v0 = vadd.f32 %v2522_v58, %v1863_v40  ;;  %v1865_v43 = vperm.slane %v5235_v56, 2 }
 0x193   :  { %2670 = vmatpush.bf16.msrb.mxu0 %v4302_v61  ;;  %v2521_v61 = vadd.f32 %v2520_v47, %v1863_v40 }
 0x194   :  { %3025 = vmatpush.bf16.msrb.mxu1 %v4850_v46 }
 0x195   :  { %2712 = vmatpush.bf16.msra.mxu2 %v4178_v57  ;;  %v4847_v57 = vld [vmem:[#allocation11 + $0x40] sm:$0xff] }
 0x197   :  { %2671 = vmatpush.bf16.msrb.mxu0 %v4286_v5 }
 0x198   :  { %3026 = vmatpush.bf16.msrb.mxu1 %v4849_v49  ;;  %v4864_v49 = vld [vmem:[#allocation11 + $0xc8] sm:$0xff] }
 0x199   :  { %2713 = vmatpush.bf16.msra.mxu2 %v4162_v62 }
 0x19b   :  { %2672 = vmatpush.bf16.msrb.mxu0 %v4270_v13  ;;  %v4856_v13 = vld [vmem:[#allocation11 + $0x88] sm:$0xff] }
 0x19c   :  { %3027 = vmatpush.bf16.msrb.mxu1 %v4848_v52 }
 0x19d   :  { %2714 = vmatpush.bf16.msra.mxu2 %v4146_v3 }
 0x19e   :  { %2673 = vmatmul.bf16.vlgmr.msrb.gmra.mxu0 %v5227_v33 }
 0x19f   :  { %2721 = vmatpush.bf16.msra.mxu0 %v4386_v14 }
 0x1a0   :  { %2715 = vmatmul.bf16.vlgmr.msra.gmra.mxu2 %v5221_v27  ;;  %v4816_v27 = vld [vmem:[#allocation8 + $0x34c] sm:$0xf]  ;;  %3028 = vmatpush.bf16.msrb.mxu1 %v4847_v57 }
 0x1a1   :  { %v4306_v26 = vor.u32 %v4816_v27, %v4303_v4  ;;  %v2534_v7 = vpop.f32.mrf.mxu1  ;;  %3035 = vmatpush.bf16.msrb.mxu2 %v4862_v9  ;;  %v4868_v4 = vld [vmem:[#allocation11 + $0xe8] sm:$0xff] }
 0x1a2   :  { %v2535_v1 = vadd.f32 %v2534_v7, %v2521_v61 }
 0x1a3   :  { %2722 = vmatpush.bf16.msra.mxu0 %v4370_v16 }
 0x1a5   :  { %3036 = vmatpush.bf16.msrb.mxu2 %v4861_v51 }
 0x1a7   :  { %2723 = vmatpush.bf16.msra.mxu0 %v4354_v19  ;;  %v1864_v19 = vperm.slane %v5235_v56, 1 }
 0x1a9   :  { %3037 = vmatpush.bf16.msrb.mxu2 %v4860_v53  ;;  %v2536_v60 = vpop.f32.mrf.mxu1  ;;  %v2576_v63 = vpop.f32.mrf.mxu3 }
 0x1aa   :  { %v2537_v5 = vadd.f32 %v2536_v60, %v2523_v0  ;;  %v2577_v27 = vadd.f32 %v2576_v63, %v1864_v19 }
 0x1ab   :  { %2724 = vmatpush.bf16.msra.mxu0 %v4338_v23 }
 0x1ad   :  { %3038 = vmatpush.bf16.msrb.mxu2 %v4859_v37  ;;  %v4863_v37 = vld [vmem:[#allocation11 + $0xc0] sm:$0xff] }
 0x1af   :  { %2725 = vmatpush.bf16.msra.mxu0 %v4322_v25 }
 0x1b1   :  { %3039 = vmatpush.bf16.msrb.mxu2 %v4858_v42  ;;  %v2590_v3 = vpop.f32.mrf.mxu1  ;;  %v2578_v20 = vpop.f32.mrf.mxu3 }
 0x1b2   :  { %v2591_v50 = vadd.f32 %v2590_v3, %v2577_v27 }
 0x1b3   :  { %2726 = vmatpush.bf16.msra.mxu0 %v4306_v26  ;;  %v2579_v26 = vadd.f32 %v2578_v20, %v1864_v19 }
 0x1b5   :  { %3040 = vmatpush.bf16.msrb.mxu2 %v4857_v2  ;;  %v1866_v2 = vperm.slane %v5235_v56, 3  ;;  %v4886_v56 = vld [vmem:[%s5253_s6] ss:$0 sm:$0xff]  ;;  %s5078_s6 = smov 128  }
 0x1b7   :  { %2727 = vmatpush.bf16.msra.mxu0 %v4290_v21 }
 0x1b9   :  { %3041 = vmatpush.bf16.msrb.mxu2 %v4856_v13  ;;  %v2592_v23 = vpop.f32.mrf.mxu1 }
 0x1ba   :  { %v2593_v28 = vadd.f32 %v2592_v23, %v2579_v26 }
 0x1bb   :  { %2728 = vmatpush.bf16.msra.mxu0 %v4274_v31 }
 0x1bd   :  { %3042 = vmatpush.bf16.msrb.mxu2 %v4855_v17 }
 0x1be   :  { %2729 = vmatmul.bf16.vlgmr.msra.gmra.mxu0 %v5227_v33  ;;  %v4839_v33 = vld [vmem:[#allocation11] sm:$0xff] }
 0x1bf   :  { %3014 = vmatpush.bf16.msrb.mxu3 %v4839_v33  ;;  %3049 = vmatpush.bf16.msrb.mxu0 %v4870_v18  ;;  %v4865_v33 = vld [vmem:[#allocation11 + $0xd0] sm:$0xff] }
 0x1c2   :  { %v2646_v8 = vpop.f32.mrf.mxu1 }
 0x1c3   :  { %3050 = vmatpush.bf16.msrb.mxu0 %v4869_v55 }
 0x1c7   :  { %3051 = vmatpush.bf16.msrb.mxu0 %v4868_v4 }
 0x1c9   :  { %v2632_v30 = vpop.f32.mrf.mxu3 }
 0x1ca   :  { %v2633_v9 = vadd.f32 %v2632_v30, %v1865_v43  ;;  %v2648_v7 = vpop.f32.mrf.mxu1 }
 0x1cb   :  { %3052 = vmatpush.bf16.msrb.mxu0 %v4867_v29 }
 0x1cf   :  { %3053 = vmatpush.bf16.msrb.mxu0 %v4866_v41 }
 0x1d1   :  { %v2634_v54 = vpop.f32.mrf.mxu3 }
 0x1d2   :  { %v2635_v47 = vadd.f32 %v2634_v54, %v1865_v43 }
 0x1d3   :  { %3054 = vmatpush.bf16.msrb.mxu0 %v4865_v33 }
 0x1d4   :  { %v2649_v52 = vadd.f32 %v2648_v7, %v2635_v47 }
 0x1d7   :  { %3055 = vmatpush.bf16.msrb.mxu0 %v4864_v49 }
 0x1db   :  { %3056 = vmatpush.bf16.msrb.mxu0 %v4863_v37 }
 0x1dd   :  { %v2548_v48 = vpop.f32.mrf.mxu2 }
 0x1de   :  { %v2549_v6 = vadd.f32 %v2548_v48, %v2535_v1  ;;  %v2647_v48 = vadd.f32 %v2646_v8, %v2633_v9 }
 0x1e4   :  { %v2702_v0 = vpop.f32.mrf.mxu1 }
 0x1e5   :  { %v2550_v59 = vpop.f32.mrf.mxu2 }
 0x1e6   :  { %v2551_v10 = vadd.f32 %v2550_v59, %v2537_v5 }
 0x1e9   :  { %v2688_v61 = vpop.f32.mrf.mxu3 }
 0x1ea   :  { %v2689_v5 = vadd.f32 %v2688_v61, %v1866_v2 }
 0x1ed   :  { %v2604_v11 = vpop.f32.mrf.mxu2 }
 0x1ee   :  { %v2605_v21 = vadd.f32 %v2604_v11, %v2591_v50 }
 0x1f1   :  { %v2690_v63 = vpop.f32.mrf.mxu3 }
 0x1f2   :  { %v2691_v11 = vadd.f32 %v2690_v63, %v1866_v2 }
 0x1f5   :  { %v2606_v24 = vpop.f32.mrf.mxu2 }
 0x1f6   :  { %v2607_v31 = vadd.f32 %v2606_v24, %v2593_v28 }
 0x1fb   :  { %v2562_v62 = vpop.f32.mrf.mxu0 }
 0x1fc   :  { %v2563_v12 = vadd.f32 %v2562_v62, %v2549_v6  ;;  %v2704_v6 = vpop.f32.mrf.mxu1 }
 0x1fd   :  { %v2705_v13 = vadd.f32 %v2704_v6, %v2691_v11 }
 0x1fe   :  { %v2735_v35 = vmax.f32 %v2563_v12, 0.0 }
 0x203   :  { %v2564_v14 = vpop.f32.mrf.mxu0  ;;  %v2660_v36 = vpop.f32.mrf.mxu2 }
 0x204   :  { %v2565_v15 = vadd.f32 %v2564_v14, %v2551_v10  ;;  %v2661_v53 = vadd.f32 %v2660_v36, %v2647_v48  ;;  %v2703_v10 = vadd.f32 %v2702_v0, %v2689_v5 }
 0x206   :  { %v2739_v16 = vmax.f32 %v2565_v15, 0.0 }
 0x208   :  { %v2743_v22 = vpack.c.bf16 %v2739_v16, %v2735_v35 }
 0x20a   :  { %3015 = vmatmul.bf16.vlgmr.msrb.gmra.mxu3 %v2743_v22 }
 0x20b   :  { %v2618_v25 = vpop.f32.mrf.mxu0  ;;  %v2662_v51 = vpop.f32.mrf.mxu2 }
 0x20c   :  { %v2619_v32 = vadd.f32 %v2618_v25, %v2605_v21  ;;  %v2663_v60 = vadd.f32 %v2662_v51, %v2649_v52 }
 0x20e   :  { %v2736_v38 = vmax.f32 %v2619_v32, 0.0 }
 0x213   :  { %v2620_v34 = vpop.f32.mrf.mxu0 }
 0x214   :  { %v2621_v45 = vadd.f32 %v2620_v34, %v2607_v31 }
 0x216   :  { %v2740_v39 = vmax.f32 %v2621_v45, 0.0 }
 0x218   :  { %v2744_v44 = vpack.c.bf16 %v2740_v39, %v2736_v38 }
 0x21a   :  { %3029 = vmatmul.bf16.vlgmr.msrb.gmra.mxu1 %v2744_v44 }
 0x21b   :  { %v2674_v46 = vpop.f32.mrf.mxu0 }
 0x21c   :  { %v2675_v57 = vadd.f32 %v2674_v46, %v2661_v53 }
 0x21e   :  { %v2737_v40 = vmax.f32 %v2675_v57, 0.0 }
 0x223   :  { %v2676_v58 = vpop.f32.mrf.mxu0  ;;  %v2716_v1 = vpop.f32.mrf.mxu2 }
 0x224   :  { %v2677_v59 = vadd.f32 %v2676_v58, %v2663_v60  ;;  %v2717_v14 = vadd.f32 %v2716_v1, %v2703_v10 }
 0x226   :  { %v2741_v42 = vmax.f32 %v2677_v59, 0.0 }
 0x228   :  { %v2745_v62 = vpack.c.bf16 %v2741_v42, %v2737_v40 }
 0x22a   :  { %3043 = vmatmul.bf16.vlgmr.msrb.gmra.mxu2 %v2745_v62 }
 0x22b   :  { %v2718_v12 = vpop.f32.mrf.mxu2 }
 0x22c   :  { %v2719_v15 = vadd.f32 %v2718_v12, %v2705_v13 }
 0x23b   :  { %v2730_v3 = vpop.f32.mrf.mxu0 }
 0x23c   :  { %v2731_v35 = vadd.f32 %v2730_v3, %v2717_v14 }
 0x23e   :  { %v2738_v18 = vmax.f32 %v2731_v35, 0.0 }
 0x243   :  { %v2732_v16 = vpop.f32.mrf.mxu0 }
 0x244   :  { %v2733_v17 = vadd.f32 %v2732_v16, %v2719_v15 }
 0x246   :  { %v2742_v19 = vmax.f32 %v2733_v17, 0.0 }
 0x248   :  { %v2746_v22 = vpack.c.bf16 %v2742_v19, %v2738_v18 }
 0x24a   :  { %3057 = vmatmul.bf16.vlgmr.msrb.gmra.mxu0 %v2746_v22 }
 0x28d   :  { %v3016_v20 = vpop.f32.mrf.mxu3 }
 0x28e   :  { %v3017_v24 = vadd.f32 %v4886_v56, %v3016_v20 }
 0x295   :  { %v3018_v4 = vpop.f32.mrf.mxu3 }
 0x296   :  { %v3019_v21 = vadd.f32 %v4886_v56, %v3018_v4 }
 0x297   :  { %v3030_v23 = vpop.f32.mrf.mxu1 }
 0x298   :  { %v3031_v25 = vadd.f32 %v3030_v23, %v3017_v24 }
 0x29f   :  { %v3032_v28 = vpop.f32.mrf.mxu1 }
 0x2a0   :  { %v3033_v30 = vadd.f32 %v3032_v28, %v3019_v21 }
 0x2ad   :  { %v3044_v55 = vpop.f32.mrf.mxu2 }
 0x2ae   :  { %v3045_v27 = vadd.f32 %v3044_v55, %v3031_v25 }
 0x2b5   :  { %v3046_v29 = vpop.f32.mrf.mxu2 }
 0x2b6   :  { %v3047_v31 = vadd.f32 %v3046_v29, %v3033_v30 }
 0x2c7   :  { %v3058_v26 = vpop.f32.mrf.mxu0 }
 0x2c8   :  { %v3059_v50 = vadd.f32 %v3058_v26, %v3045_v27 }
 0x2ca   :  { %3063 = vst [vmem:[#allocation13] sm:$0xff] %v3059_v50 }
 0x2cf   :  { %v3060_v32 = vpop.f32.mrf.mxu0 }
 0x2d0   :  { %v3061_v8 = vadd.f32 %v3060_v32, %v3047_v31 }
 0x2d2   :  { %3064 = vst [vmem:[#allocation13 + $0x8] sm:$0xff] %v3061_v8 }
 0x2d3   :  { %3077 = dma.vmem_to_hbm [thread:$0]  %s3070_s11, 256, %s3072_s14, [#allocation4], %s5078_s6, %s5078_s6, %s5079_s15  }
 0x2d4   :  { %5063 = dma.done.wait [#allocation4], 256  }
 0x2d5   :  { %5064 = vsyncadd [#allocation4], 4294967040 }
 0x2d6   :  { %3082 = vsyncpa [#allocation3], 1 }
 0x2d7   :  { %3083 = vsyncpa [#allocation6], 1 }
 0x2d8   :  { %3084 = vsyncpa [#allocation9], 1 }
 0x2d9   :  { %3085 = vsyncpa [#allocation12], 1 }
 0x2da   :  { %3086 = vsyncpa [#allocation4], 1 }

</bundles_post_ra>
